<compile_context>
chip_gen: v7x
topology: tpu7x:2x2x1
jax: 0.10.0
libtpu: 0.0.40
codegen_flags: <defaults>
</compile_context>

<pallas_src>
import math

import jax
import jax.numpy as jnp
from jax import lax
from jax.experimental import pallas as pl
from jax.experimental.pallas import tpu as pltpu


def cnn_kernel(x_ref, pp_ref, w2_ref, wfc_ref, seg_ref, bfc_ref, o_ref):
    # x_ref:   (1, 1, BT*L)  f32 input row, lanes = b*L + l
    # pp_ref:  (C, 8)        f32 packed params: [:,0:3]=w1, [:,3:4]=b1, [:,4:5]=b2
    # w2_ref:  (C, 3C)       bf16 conv2 weight, tap-major K: w2[c_out, k*C + c_in]
    # wfc_ref: (C, BT*L)     bf16 fc weight (C, L) tiled across the batch tile
    # seg_ref: (BT*L, BT)    bf16 per-batch-element lane-sum selector
    # bfc_ref: (1,)          f32 scalar in SMEM
    # o_ref:   (1, 1, BT)    f32 output
    BTL, BT = seg_ref.shape
    L = BTL // BT
    C = w2_ref.shape[0]

    x = x_ref[0]                                           # (1, BT*L) f32

    # Boundary masks built in-kernel from a lane iota (no mask DMA).
    lane = lax.broadcasted_iota(jnp.int32, (1, BTL), 1)
    if (L & (L - 1)) == 0:                                 # static branch
        pos = jnp.bitwise_and(lane, L - 1)                 # lane % L (L power of 2)
    else:
        pos = lane % L
    mm = (pos >= 1).astype(jnp.float32)                    # tap l-1 valid
    mp = (pos <= L - 2).astype(jnp.float32)                # tap l+1 valid

    # ---- Conv1d(1 -> C, k=3, pad=1) + ReLU : one small MXU matmul ----
    x_m = mm * pltpu.roll(x, shift=1, axis=1)              # x[:, l-1]
    x_p = mp * pltpu.roll(x, shift=BTL - 1, axis=1)        # x[:, l+1]
    taps = jnp.concatenate([x_m, x, x_p], axis=0)          # (3, BT*L)
    w1 = pp_ref[:, 0:3]                                    # (C, 3)
    b1 = pp_ref[:, 3:4]                                    # (C, 1)
    b2 = pp_ref[:, 4:5]                                    # (C, 1)
    h1 = jnp.dot(w1, taps, preferred_element_type=jnp.float32) + b1
    h1 = jnp.maximum(h1, 0.0)                              # (C, BT*L) f32

    # ---- Conv1d(C -> C, k=3, pad=1) + ReLU : one fused MXU matmul (bf16 in) ----
    h1_m = mm * pltpu.roll(h1, shift=1, axis=1)            # h1[:, l-1]
    h1_p = mp * pltpu.roll(h1, shift=BTL - 1, axis=1)      # h1[:, l+1]
    h_stack = jnp.concatenate([h1_m, h1, h1_p], axis=0).astype(jnp.bfloat16)
    h2 = jnp.dot(w2_ref[...], h_stack,
                 preferred_element_type=jnp.float32) + b2
    h2 = jnp.maximum(h2, 0.0)                              # (C, BT*L) f32

    # ---- Linear(C*L -> 1) per batch element: VPU multiply + MXU segment-sum ----
    prod = (h2 * wfc_ref[...].astype(jnp.float32)).astype(jnp.bfloat16)
    per_c = jnp.dot(prod, seg_ref[...],
                    preferred_element_type=jnp.float32)    # (C, BT)
    out = jnp.sum(per_c, axis=0, keepdims=True)            # (1, BT)
    o_ref[0] = out + bfc_ref[0]


def cnn_forward(x, params):
    """x: (B, L) float32  ->  (B,) float32"""
    B, L = x.shape
    C = params["w1"].shape[0]

    # Batch-tile size BT:
    #  * BT*L a multiple of 128 (full vregs, lane-dense tiles)
    #  * aim for ~2048-lane activation tiles (tile-sweep sweet spot)
    #  * cap BT at 256 so the (BT*L, BT) selector fits v7x's 64 MiB VMEM.
    unit = 128 // math.gcd(L, 128)          # BT granularity for 128-lane alignment
    BT = max(unit, min(256, (2048 // max(L, 1)) // unit * unit))
    G = pl.cdiv(B, BT)                      # grid steps (shards across v7x's 2 TCs)
    B_pad = G * BT

    xb = jnp.pad(x, ((0, B_pad - B), (0, 0))).reshape(G, 1, BT * L)

    # Packed tiny params: cols 0-2 = w1 taps, col 3 = b1, col 4 = b2.
    pp = jnp.zeros((C, 8), jnp.float32)
    pp = pp.at[:, 0:3].set(params["w1"].reshape(C, 3))
    pp = pp.at[:, 3].set(params["b1"])
    pp = pp.at[:, 4].set(params["b2"])

    w2 = jnp.transpose(params["w2"], (0, 2, 1)).reshape(C, 3 * C)   # tap-major K
    w2 = w2.astype(jnp.bfloat16)
    wfc = jnp.tile(params["wfc"].reshape(C, L), (1, BT)).astype(jnp.bfloat16)
    seg = jnp.repeat(jnp.eye(BT, dtype=jnp.bfloat16), L, axis=0)    # (BT*L, BT)
    bfc = params["bfc"].reshape(1)

    out = pl.pallas_call(
        cnn_kernel,
        out_shape=jax.ShapeDtypeStruct((G, 1, BT), jnp.float32),
        grid=(G,),
        in_specs=[
            pl.BlockSpec((1, 1, BT * L), lambda g: (g, 0, 0)),   # x row (grid-varying)
            pl.BlockSpec((C, 8), lambda g: (0, 0)),              # packed w1/b1/b2
            pl.BlockSpec((C, 3 * C), lambda g: (0, 0)),          # w2 (bf16)
            pl.BlockSpec((C, BT * L), lambda g: (0, 0)),         # wfc tiled (bf16)
            pl.BlockSpec((BT * L, BT), lambda g: (0, 0)),        # seg selector (bf16)
            pl.BlockSpec(memory_space=pltpu.MemorySpace.SMEM),   # bfc scalar
        ],
        out_specs=pl.BlockSpec((1, 1, BT), lambda g: (g, 0, 0)),
        compiler_params=pltpu.CompilerParams(
            dimension_semantics=("parallel",)),
    )(xb, pp, w2, wfc, seg, bfc)

    return out.reshape(B_pad)[:B]


def cnn_reference(x, params):
    """Pure-JAX reference mirroring the PyTorch forward (NCW conv layout)."""
    B, L = x.shape
    C = params["w1"].shape[0]
    xr = x[:, None, :]  # (B, 1, L)
    h = lax.conv_general_dilated(
        xr, params["w1"], window_strides=(1,), padding=((1, 1),),
        dimension_numbers=("NCH", "OIH", "NCH"), precision="highest")
    h = jnp.maximum(h + params["b1"][None, :, None], 0.0)
    h = lax.conv_general_dilated(
        h, params["w2"], window_strides=(1,), padding=((1, 1),),
        dimension_numbers=("NCH", "OIH", "NCH"), precision="highest")
    h = jnp.maximum(h + params["b2"][None, :, None], 0.0)
    flat = h.reshape(B, C * L)
    return (flat @ params["wfc"].T + params["bfc"])[:, 0]


if __name__ == "__main__":
    B, L, C = 2, 16, 16  # batch, input_dim, channels

    key = jax.random.PRNGKey(0)
    kx, k1, k2, k3, k4, k5, k6 = jax.random.split(key, 7)
    params = {
        "w1": jax.random.normal(k1, (C, 1, 3), jnp.float32) * 0.30,   # Conv1d(1, C, 3)
        "b1": jax.random.normal(k2, (C,), jnp.float32) * 0.10,
        "w2": jax.random.normal(k3, (C, C, 3), jnp.float32) * 0.15,   # Conv1d(C, C, 3)
        "b2": jax.random.normal(k4, (C,), jnp.float32) * 0.10,
        "wfc": jax.random.normal(k5, (1, C * L), jnp.float32) * 0.10, # Linear(C*L, 1)
        "bfc": jax.random.normal(k6, (1,), jnp.float32) * 0.10,
    }
    x = jax.random.normal(kx, (B, L), jnp.float32)

    out = jax.block_until_ready(cnn_forward(x, params))
    ref = jax.block_until_ready(cnn_reference(x, params))

    assert out.shape == (B,)
    assert jnp.allclose(out, ref, rtol=1e-2, atol=1e-2), (out, ref)
    print("KERNEL_OK")
</pallas_src>

<mosaic_0001>
module attributes {stable_mosaic.version = 11 : i64} {
  func.func @cnn_kernel(%arg0: i32, %arg1: memref<1x1x2048xf32, #tpu.memory_space<vmem>>, %arg2: memref<16x8xf32, #tpu.memory_space<vmem>>, %arg3: memref<16x48xbf16, #tpu.memory_space<vmem>>, %arg4: memref<16x2048xbf16, #tpu.memory_space<vmem>>, %arg5: memref<2048x128xbf16, #tpu.memory_space<vmem>>, %arg6: memref<1xf32, #tpu.memory_space<smem>>, %arg7: memref<1x1x128xf32, #tpu.memory_space<vmem>>) attributes {dimension_semantics = [#tpu.dimension_semantics<parallel>], iteration_bounds = array<i64: 1>, scalar_prefetch = 0 : i64, scratch_operands = 0 : i64, tpu.core_type = #tpu.core_type<tc>, window_params = [{transform_indices = @transform_0, window_bounds = array<i64: 1, 1, 2048>}, {pipeline_mode = #tpu.pipeline_mode<synchronous>, transform_indices = @transform_1, window_bounds = array<i64: 16, 8>}, {pipeline_mode = #tpu.pipeline_mode<synchronous>, transform_indices = @transform_2, window_bounds = array<i64: 16, 48>}, {pipeline_mode = #tpu.pipeline_mode<synchronous>, transform_indices = @transform_3, window_bounds = array<i64: 16, 2048>}, {pipeline_mode = #tpu.pipeline_mode<synchronous>, transform_indices = @transform_4, window_bounds = array<i64: 2048, 128>}, {transform_indices = @transform_5, window_bounds = array<i64: 1>}, {transform_indices = @transform_6, window_bounds = array<i64: 1, 1, 128>}]} {
    %c0 = arith.constant 0 : index
    %c0_0 = arith.constant 0 : index
    %c0_1 = arith.constant 0 : index
    %0 = vector.load %arg1[%c0, %c0_0, %c0_1] : memref<1x1x2048xf32, #tpu.memory_space<vmem>>, vector<1x1x2048xf32>
    %1 = vector.shape_cast %0 : vector<1x1x2048xf32> to vector<1x2048xf32>
    %2 = tpu.iota {dimensions = array<i32: 1>} : vector<1x2048xi32>
    %c15_i32 = arith.constant 15 : i32
    %3 = vector.broadcast %c15_i32 : i32 to vector<1x2048xi32>
    %4 = arith.andi %2, %3 : vector<1x2048xi32>
    %c1_i32 = arith.constant 1 : i32
    %5 = vector.broadcast %c1_i32 : i32 to vector<1x2048xi32>
    %6 = arith.cmpi sge, %4, %5 : vector<1x2048xi32>
    %7 = arith.extui %6 : vector<1x2048xi1> to vector<1x2048xi32>
    %8 = arith.sitofp %7 : vector<1x2048xi32> to vector<1x2048xf32>
    %c14_i32 = arith.constant 14 : i32
    %9 = vector.broadcast %c14_i32 : i32 to vector<1x2048xi32>
    %10 = arith.cmpi sle, %4, %9 : vector<1x2048xi32>
    %11 = arith.extui %10 : vector<1x2048xi1> to vector<1x2048xi32>
    %12 = arith.sitofp %11 : vector<1x2048xi32> to vector<1x2048xf32>
    %c1_i32_2 = arith.constant 1 : i32
    %13 = tpu.dynamic_rotate %1 by %c1_i32_2 dim 1 : vector<1x2048xf32>, i32 -> vector<1x2048xf32>
    %14 = arith.mulf %8, %13 : vector<1x2048xf32>
    %c2047_i32 = arith.constant 2047 : i32
    %15 = tpu.dynamic_rotate %1 by %c2047_i32 dim 1 : vector<1x2048xf32>, i32 -> vector<1x2048xf32>
    %16 = arith.mulf %12, %15 : vector<1x2048xf32>
    %17 = tpu.concatenate %14, %1, %16 in 0 : vector<1x2048xf32>, vector<1x2048xf32>, vector<1x2048xf32> -> vector<3x2048xf32>
    %c0_3 = arith.constant 0 : index
    %c0_4 = arith.constant 0 : index
    %18 = vector.load %arg2[%c0_3, %c0_4] : memref<16x8xf32, #tpu.memory_space<vmem>>, vector<16x3xf32>
    %c0_5 = arith.constant 0 : index
    %c3 = arith.constant 3 : index
    %19 = vector.load %arg2[%c0_5, %c3] : memref<16x8xf32, #tpu.memory_space<vmem>>, vector<16x1xf32>
    %c0_6 = arith.constant 0 : index
    %c4 = arith.constant 4 : index
    %20 = vector.load %arg2[%c0_6, %c4] : memref<16x8xf32, #tpu.memory_space<vmem>>, vector<16x1xf32>
    %cst = arith.constant dense<0.000000e+00> : vector<16x2048xf32>
    %21 = tpu.matmul %18, %17, %cst {dimension_numbers = #tpu.dot_dimension_numbers<[1], [0], [0], [1], [0, 0, 1, 1], [], []>} : vector<16x3xf32>, vector<3x2048xf32>, vector<16x2048xf32> -> vector<16x2048xf32>
    %22 = vector.broadcast %19 : vector<16x1xf32> to vector<16x2048xf32>
    %23 = arith.addf %21, %22 : vector<16x2048xf32>
    %cst_7 = arith.constant 0.000000e+00 : f32
    %24 = vector.broadcast %cst_7 : f32 to vector<16x2048xf32>
    %25 = arith.maximumf %23, %24 : vector<16x2048xf32>
    %c1_i32_8 = arith.constant 1 : i32
    %26 = tpu.dynamic_rotate %25 by %c1_i32_8 dim 1 : vector<16x2048xf32>, i32 -> vector<16x2048xf32>
    %27 = vector.broadcast %8 : vector<1x2048xf32> to vector<16x2048xf32>
    %28 = arith.mulf %27, %26 : vector<16x2048xf32>
    %c2047_i32_9 = arith.constant 2047 : i32
    %29 = tpu.dynamic_rotate %25 by %c2047_i32_9 dim 1 : vector<16x2048xf32>, i32 -> vector<16x2048xf32>
    %30 = vector.broadcast %12 : vector<1x2048xf32> to vector<16x2048xf32>
    %31 = arith.mulf %30, %29 : vector<16x2048xf32>
    %32 = tpu.concatenate %28, %25, %31 in 0 : vector<16x2048xf32>, vector<16x2048xf32>, vector<16x2048xf32> -> vector<48x2048xf32>
    %33 = arith.truncf %32 : vector<48x2048xf32> to vector<48x2048xbf16>
    %c0_10 = arith.constant 0 : index
    %c0_11 = arith.constant 0 : index
    %34 = vector.load %arg3[%c0_10, %c0_11] : memref<16x48xbf16, #tpu.memory_space<vmem>>, vector<16x48xbf16>
    %cst_12 = arith.constant dense<0.000000e+00> : vector<16x2048xf32>
    %35 = tpu.matmul %34, %33, %cst_12 {dimension_numbers = #tpu.dot_dimension_numbers<[1], [0], [0], [1], [0, 0, 1, 1], [], []>} : vector<16x48xbf16>, vector<48x2048xbf16>, vector<16x2048xf32> -> vector<16x2048xf32>
    %36 = vector.broadcast %20 : vector<16x1xf32> to vector<16x2048xf32>
    %37 = arith.addf %35, %36 : vector<16x2048xf32>
    %cst_13 = arith.constant 0.000000e+00 : f32
    %38 = vector.broadcast %cst_13 : f32 to vector<16x2048xf32>
    %39 = arith.maximumf %37, %38 : vector<16x2048xf32>
    %c0_14 = arith.constant 0 : index
    %c0_15 = arith.constant 0 : index
    %40 = vector.load %arg4[%c0_14, %c0_15] : memref<16x2048xbf16, #tpu.memory_space<vmem>>, vector<16x2048xbf16>
    %41 = arith.extf %40 : vector<16x2048xbf16> to vector<16x2048xf32>
    %42 = arith.mulf %39, %41 : vector<16x2048xf32>
    %43 = arith.truncf %42 : vector<16x2048xf32> to vector<16x2048xbf16>
    %c0_16 = arith.constant 0 : index
    %c0_17 = arith.constant 0 : index
    %44 = vector.load %arg5[%c0_16, %c0_17] : memref<2048x128xbf16, #tpu.memory_space<vmem>>, vector<2048x128xbf16>
    %cst_18 = arith.constant dense<0.000000e+00> : vector<16x128xf32>
    %45 = tpu.matmul %43, %44, %cst_18 {dimension_numbers = #tpu.dot_dimension_numbers<[1], [0], [0], [1], [0, 0, 1, 1], [], []>} : vector<16x2048xbf16>, vector<2048x128xbf16>, vector<16x128xf32> -> vector<16x128xf32>
    %cst_19 = arith.constant dense<0.000000e+00> : vector<128xf32>
    %46 = vector.multi_reduction <add>, %45, %cst_19 [0] : vector<16x128xf32> to vector<128xf32>
    %47 = vector.shape_cast %46 : vector<128xf32> to vector<1x128xf32>
    %c0_20 = arith.constant 0 : index
    %48 = memref.load %arg6[%c0_20] : memref<1xf32, #tpu.memory_space<smem>>
    %49 = vector.broadcast %48 : f32 to vector<1x128xf32>
    %50 = arith.addf %47, %49 : vector<1x128xf32>
    %c0_21 = arith.constant 0 : index
    %c0_22 = arith.constant 0 : index
    %c0_23 = arith.constant 0 : index
    %51 = vector.load %arg7[%c0_21, %c0_22, %c0_23] : memref<1x1x128xf32, #tpu.memory_space<vmem>>, vector<1x1x128xf32>
    %52 = vector.shape_cast %51 : vector<1x1x128xf32> to vector<1x128xf32>
    %53 = vector.shape_cast %50 : vector<1x128xf32> to vector<1x1x128xf32>
    tpu.vector_store %arg7[%c0_21, %c0_22, %c0_23], %53 {strides = array<i32>} : memref<1x1x128xf32, #tpu.memory_space<vmem>>, vector<1x1x128xf32>,
    return
  }
  func.func @transform_0(%arg0: i32) -> (i32, i32, i32) {
    %c0_i32 = arith.constant 0 : i32
    %c0_i32_0 = arith.constant 0 : i32
    %c0_i32_1 = arith.constant 0 : i32
    return %arg0, %c0_i32, %c0_i32_0 : i32, i32, i32
  }
  func.func @transform_1(%arg0: i32) -> (i32, i32) {
    %c0_i32 = arith.constant 0 : i32
    %c0_i32_0 = arith.constant 0 : i32
    %c0_i32_1 = arith.constant 0 : i32
    return %c0_i32, %c0_i32_0 : i32, i32
  }
  func.func @transform_2(%arg0: i32) -> (i32, i32) {
    %c0_i32 = arith.constant 0 : i32
    %c0_i32_0 = arith.constant 0 : i32
    %c0_i32_1 = arith.constant 0 : i32
    return %c0_i32, %c0_i32_0 : i32, i32
  }
  func.func @transform_3(%arg0: i32) -> (i32, i32) {
    %c0_i32 = arith.constant 0 : i32
    %c0_i32_0 = arith.constant 0 : i32
    %c0_i32_1 = arith.constant 0 : i32
    return %c0_i32, %c0_i32_0 : i32, i32
  }
  func.func @transform_4(%arg0: i32) -> (i32, i32) {
    %c0_i32 = arith.constant 0 : i32
    %c0_i32_0 = arith.constant 0 : i32
    %c0_i32_1 = arith.constant 0 : i32
    return %c0_i32, %c0_i32_0 : i32, i32
  }
  func.func @transform_5(%arg0: i32) -> i32 {
    %c0_i32 = arith.constant 0 : i32
    %c0_i32_0 = arith.constant 0 : i32
    return %c0_i32 : i32
  }
  func.func @transform_6(%arg0: i32) -> (i32, i32, i32) {
    %c0_i32 = arith.constant 0 : i32
    %c0_i32_0 = arith.constant 0 : i32
    %c0_i32_1 = arith.constant 0 : i32
    return %arg0, %c0_i32, %c0_i32_0 : i32, i32, i32
  }
}

</mosaic_0001>

<bundles_post_ra>
// kernel: tpu_custom_call.1
= control target key start
LH: loop header
LB: loop body
LE: loop exit
PB: predicated region body
PF: predicated region fallthrough
CT: control target
= control target key end

     0   :  { %12 = vsyncpa [#allocation4], 0  ;;  %s5252_s0 = inlined_call_operand.vmem [shape: f32[1,1,2048], index: 0, kind: input, shape index: {}]   ;;  %s5253_s1 = inlined_call_operand.vmem [shape: f32[16,8], index: 1, kind: input, shape index: {}]   ;;  %s5254_s2 = inlined_call_operand.vmem [shape: bf16[16,48], index: 2, kind: input, shape index: {}]   ;;  %s5255_s3 = inlined_call_operand.hbm [shape: bf16[16,2048], index: 3, kind: input, shape index: {}]   ;;  %s5256_s4 = inlined_call_operand.hbm [shape: bf16[2048,128], index: 4, kind: input, shape index: {}]   ;;  %s5257_s5 = inlined_call_operand.<no memory space> [shape: f32[1], index: 5, kind: input, shape index: {}]   ;;  %s5258_s6 = inlined_call_operand.hbm [shape: f32[1,1,128], index: 6, kind: output, shape index: {}]  }
   0x1   :  { %13 = vsyncpa [#allocation7], 0 }
   0x2   :  { %14 = vsyncpa [#allocation5], 0  ;;  %s3963_s21 = smov [#allocation3]   ;;  %s3891_s25 = scalar_lea.hbm %s5255_s3, 2048 }
   0x3   :  { %s26_s22 = sshll.u32 %s3963_s21, 4  ;;  %p3892_p0 = scmp.ne.s32.totalorder %s5255_s3, %s3891_s25  ;;  %s27_s22 = int_to_ptr.vmem [resolvable:$true] %s26_s22 }
   0x4   :  { %p3895_p1 = scmp.lt.u32.totalorder %s3891_s25, %s5255_s3 }
   0x6   :  { %p3897_p2 = pnand %p3895_p1, %p3892_p0 }
   0x8   :  { %3900 = shalt.err (!%p3897_p2)
}
   0x9   :  { %s3901_s30 = scalar_lea.vmem %s27_s22, 2048  ;;  %p3906_p4 = scmp.lt.s32.totalorder %s27_s22, %s27_s22 }
   0xa   :  { %p3902_p3 = scmp.ne.s32.totalorder %s27_s22, %s3901_s30  ;;  %p3907_p5 = scmp.lt.s32.totalorder %s3901_s30, %s3901_s30 }
   0xc   :  { %p3908_p6 = por %p3907_p5, %p3906_p4 }
   0xe   :  { %p3909_p7 = pnand %p3908_p6, %p3902_p3 }
  0x10   :  { %3912 = shalt.err (!%p3909_p7)
}
  0x11   :  { %s3964_s7 = smov 1024   ;;  %s3965_s8 = smov 64  }
  0x12   :  { %32 = dma.hbm_to_vmem [thread:$0]  %s5255_s3, 2048, %s27_s22, [#allocation4], %s3964_s7, %s3964_s7, %s3965_s8  }
  0x13   :  { %s3966_s11 = smov [#allocation6]   ;;  %s3913_s15 = scalar_lea.hbm %s5256_s4, 16384 }
  0x14   :  { %s38_s12 = sshll.u32 %s3966_s11, 4  ;;  %p3914_p8 = scmp.ne.s32.totalorder %s5256_s4, %s3913_s15  ;;  %s39_s12 = int_to_ptr.vmem [resolvable:$true] %s38_s12 }
  0x15   :  { %p3917_p9 = scmp.lt.u32.totalorder %s3913_s15, %s5256_s4 }
  0x17   :  { %p3919_p10 = pnand %p3917_p9, %p3914_p8 }
  0x19   :  { %3922 = shalt.err (!%p3919_p10)
}
  0x1a   :  { %s3923_s20 = scalar_lea.vmem %s39_s12, 16384  ;;  %p3928_p12 = scmp.lt.s32.totalorder %s39_s12, %s39_s12 }
  0x1b   :  { %p3924_p11 = scmp.ne.s32.totalorder %s39_s12, %s3923_s20  ;;  %p3929_p13 = scmp.lt.s32.totalorder %s3923_s20, %s3923_s20 }
  0x1d   :  { %p3930_p0 = por %p3929_p13, %p3928_p12 }
  0x1f   :  { %p3931_p1 = pnand %p3930_p0, %p3924_p11 }
  0x21   :  { %3934 = shalt.err (!%p3931_p1)
}
  0x22   :  { %s3967_s3 = smov 4  }
  0x23   :  { %44 = dma.hbm_to_vmem [thread:$0]  %s5256_s4, 16384, %s39_s12, [#allocation7], %s3965_s8, %s3965_s8, %s3967_s3  }
  0x24   :  { %3957 = dma.done.wait [#allocation4], 2048  }
  0x25   :  { %3958 = vsyncadd [#allocation4], 4294965248 }
  0x26   :  { %3959 = dma.done.wait [#allocation7], 16384  }
  0x27   :  { %3960 = vsyncadd [#allocation7], 4294950912  ;;  %v56_v0 = vlaneseq  ;;  %v5259_v1 = vmov 0.0   ;;  %v54_v6 = vld [vmem:[%s5252_s0] sm:$0xff]  ;;  %s3969_s4 = smov 127   ;;  %s3970_s25 = smov 1  }
  0x28   :  { %686 = vmatprep.mubr.f32.mxu1 %v5259_v1  ;;  %609 = vmatprep.mubr.f32.mxu0 %v5259_v1  ;;  %v55_v14 = vld [vmem:[%s5252_s0 + $0x8] sm:$0xff]  ;;  %v4142_v29 = vld [vmem:[%s5253_s1] sm:$0xff]  ;;  %v3971_v31 = vmov 3   ;;  %vm445_vm6 = vcmask 1040384   ;;  %vm462_vm7 = vcmask 1041408   ;;  %vm496_vm8 = vcmask 1042432  }
  0x29   :  { %v188_v2 = vshrl.u32 %v56_v0, 7  ;;  %v4147_v30 = vld [vmem:[%s5253_s1 + $0x8] sm:$0xff]  ;;  %3757 = vset.pattern.permute.xlu1 %v3971_v31  ;;  %3756 = vset.pattern.permute.xlu0 %v3971_v31  ;;  %v4152_v32 = vand.u32 127, %v56_v0  ;;  %vm491_vm11 = vcmask 23552   ;;  %s3974_s13 = smov [#allocation8]  }
  0x2a   :  { %s3357_s14 = sshll.u32 %s3974_s13, 4  ;;  %s3358_s14 = int_to_ptr.vmem [resolvable:$true] %s3357_s14 }
  0x2b   :  { %v201_v3 = vsub.s32 3, %v188_v2  ;;  %v197_v4 = vsub.s32 2, %v188_v2  ;;  %v205_v5 = vsub.s32 4, %v188_v2  ;;  %v193_v10 = vsub.s32 1, %v188_v2  ;;  %s3935_s15 = scalar_lea.vmem %s3358_s14, 16  ;;  %s3939_s16 = scalar_lea.vmem %s3358_s14, 32 }
  0x2c   :  { %v217_v12 = vsub.s32 7, %v188_v2  ;;  %v189_v13 = vsub.s32 0, %v188_v2  ;;  %v213_v17 = vsub.s32 6, %v188_v2  ;;  %v209_v19 = vsub.s32 5, %v188_v2  ;;  %p3936_p2 = scmp.ne.s32.totalorder %s3358_s14, %s3935_s15  ;;  %p3940_p3 = scmp.lt.s32.totalorder %s3358_s14, %s3358_s14 }
  0x2d   :  { %v4040_v7 = vrot.slane %v54_v6, %v201_v3  ;;  %v4042_v8 = vrot.slane %v54_v6, %v197_v4  ;;  %v4048_v9 = vrot.slane %v54_v6, %v205_v5  ;;  %v4054_v11 = vrot.slane %v54_v6, %v193_v10  ;;  %p3941_p4 = scmp.lt.s32.totalorder %s3939_s16, %s3935_s15 }
  0x2e   :  { %v4063_v15 = vrot.slane %v54_v6, %v217_v12  ;;  %v4065_v16 = vrot.slane %v55_v14, %v189_v13  ;;  %v4071_v18 = vrot.slane %v54_v6, %v213_v17  ;;  %v4077_v20 = vrot.slane %v54_v6, %v209_v19 }
  0x2f   :  { %338 = vrot.lane.b32.xlu0 %v4040_v7, %s3969_s4  ;;  %271 = vrot.lane.b32.xlu1 %v4042_v8, %s3970_s25  ;;  %v4083_v21 = vrot.slane %v55_v14, %v201_v3  ;;  %v4085_v22 = vrot.slane %v55_v14, %v205_v5  ;;  %v4091_v23 = vrot.slane %v55_v14, %v197_v4  ;;  %v60_v33 = vadd.s32 384, %v4152_v32  ;;  %p3942_p5 = por %p3941_p4, %p3940_p3 }
  0x30   :  { %v4097_v24 = vrot.slane %v55_v14, %v193_v10  ;;  %v4103_v25 = vrot.slane %v54_v6, %v189_v13  ;;  %v4109_v26 = vrot.slane %v55_v14, %v217_v12  ;;  %v4115_v27 = vrot.slane %v55_v14, %v213_v17 }
  0x31   :  { %v4121_v28 = vrot.slane %v55_v14, %v209_v19  ;;  %v76_v34 = vand.u32 15, %v60_v33  ;;  %v59_v35 = vadd.s32 256, %v4152_v32  ;;  %v64_v39 = vadd.s32 896, %v4152_v32  ;;  %p3943_p6 = pnand %p3942_p5, %p3936_p2 }
  0x32   :  { %vm364_vm2 = vcmp.lt.s32.totalorder %v4152_v32, 127  ;;  %vm299_vm3 = vcmp.lt.s32.totalorder %v4152_v32, 1  ;;  %v63_v55 = vadd.s32 768, %v4152_v32  ;;  %v68_v5 = vadd.s32 1408, %v4152_v32 }
  0x33   :  { %340 = vrot.lane.b32.xlu0 %v4048_v9, %s3969_s4  ;;  %273 = vrot.lane.b32.xlu1 %v4040_v7, %s3970_s25  ;;  %vm140_vm0 = vcmp.le.s32.totalorder %v76_v34, 14  ;;  %vm92_vm1 = vcmp.ge.s32.totalorder %v76_v34, 1  ;;  %v75_v38 = vand.u32 15, %v59_v35  ;;  %v80_v46 = vand.u32 15, %v64_v39 }
  0x34   :  { %v4160_v40 = vsel %vm140_vm0, 1.0, %v5259_v1  ;;  %v4163_v41 = vsel %vm92_vm1, 1.0, %v5259_v1  ;;  %v79_v3 = vand.u32 15, %v63_v55  ;;  %v84_v14 = vand.u32 15, %v68_v5 }
  0x35   :  { %vm139_vm4 = vcmp.le.s32.totalorder %v75_v38, 14  ;;  %vm91_vm5 = vcmp.ge.s32.totalorder %v75_v38, 1  ;;  %vm144_vm9 = vcmp.le.s32.totalorder %v80_v46, 14  ;;  %vm96_vm10 = vcmp.ge.s32.totalorder %v80_v46, 1 }
  0x36   :  { %v4178_v49 = vsel %vm139_vm4, 1.0, %v5259_v1  ;;  %v4181_v50 = vsel %vm91_vm5, 1.0, %v5259_v1  ;;  %v4201_v63 = vsel %vm144_vm9, 1.0, %v5259_v1  ;;  %v4215_v10 = vsel %vm96_vm10, 1.0, %v5259_v1 }
  0x37   :  { %336 = vrot.lane.b32.xlu0 %v4042_v8, %s3969_s4  ;;  %269 = vrot.lane.b32.xlu1 %v4054_v11, %s3970_s25  ;;  %vm143_vm12 = vcmp.le.s32.totalorder %v79_v3, 14  ;;  %vm95_vm13 = vcmp.ge.s32.totalorder %v79_v3, 1  ;;  %v67_v19 = vadd.s32 1280, %v4152_v32  ;;  %vm148_vm14 = vcmp.le.s32.totalorder %v84_v14, 14 }
  0x38   :  { %v4228_v33 = vsel %vm143_vm12, 1.0, %v5259_v1  ;;  %v4231_v34 = vsel %vm95_vm13, 1.0, %v5259_v1  ;;  %vm100_vm15 = vcmp.ge.s32.totalorder %v84_v14, 1  ;;  %v4256_v55 = vsel %vm148_vm14, 1.0, %v5259_v1 }
  0x39   :  { %v83_v46 = vand.u32 15, %v67_v19  ;;  %5299 = vst [vmem:[#allocation12_spill] sm:$0xff] %v4256_v55  ;;  %v73_v3 = vand.u32 15, %v4152_v32 }
  0x3b   :  { %346 = vrot.lane.b32.xlu0 %v4063_v15, %s3969_s4  ;;  %348 = vrot.lane.b32.xlu1 %v4065_v16, %s3969_s4  ;;  %vm147_vm0 = vcmp.le.s32.totalorder %v83_v46, 14  ;;  %vm99_vm1 = vcmp.ge.s32.totalorder %v83_v46, 1  ;;  %vm137_vm9 = vcmp.le.s32.totalorder %v73_v3, 14  ;;  %vm89_vm12 = vcmp.ge.s32.totalorder %v73_v3, 1 }
  0x3c   :  { %v66_v3 = vadd.s32 1152, %v4152_v32 }
  0x3f   :  { %279 = vrot.lane.b32.xlu0 %v4071_v18, %s3970_s25  ;;  %281 = vrot.lane.b32.xlu1 %v4063_v15, %s3970_s25 }
  0x43   :  { %344 = vrot.lane.b32.xlu0 %v4071_v18, %s3969_s4  ;;  %277 = vrot.lane.b32.xlu1 %v4077_v20, %s3970_s25 }
  0x47   :  { %354 = vrot.lane.b32.xlu0 %v4083_v21, %s3969_s4  ;;  %356 = vrot.lane.b32.xlu1 %v4085_v22, %s3969_s4 }
  0x4b   :  { %287 = vrot.lane.b32.xlu0 %v4091_v23, %s3970_s25  ;;  %289 = vrot.lane.b32.xlu1 %v4083_v21, %s3970_s25 }
  0x4f   :  { %352 = vrot.lane.b32.xlu0 %v4091_v23, %s3969_s4  ;;  %285 = vrot.lane.b32.xlu1 %v4097_v24, %s3970_s25 }
  0x53   :  { %334 = vrot.lane.b32.xlu0 %v4054_v11, %s3969_s4  ;;  %267 = vrot.lane.b32.xlu1 %v4103_v25, %s3970_s25 }
  0x57   :  { %332 = vrot.lane.b32.xlu0 %v4103_v25, %s3969_s4  ;;  %362 = vrot.lane.b32.xlu1 %v4109_v26, %s3969_s4 }
  0x5b   :  { %295 = vrot.lane.b32.xlu0 %v4115_v27, %s3970_s25  ;;  %297 = vrot.lane.b32.xlu1 %v4109_v26, %s3970_s25 }
  0x5f   :  { %360 = vrot.lane.b32.xlu0 %v4115_v27, %s3969_s4  ;;  %293 = vrot.lane.b32.xlu1 %v4121_v28, %s3970_s25 }
  0x63   :  { %342 = vrot.lane.b32.xlu0 %v4077_v20, %s3969_s4  ;;  %275 = vrot.lane.b32.xlu1 %v4048_v9, %s3970_s25 }
  0x67   :  { %350 = vrot.lane.b32.xlu0 %v4097_v24, %s3969_s4  ;;  %283 = vrot.lane.b32.xlu1 %v4065_v16, %s3970_s25 }
  0x6b   :  { %358 = vrot.lane.b32.xlu0 %v4121_v28, %s3969_s4  ;;  %291 = vrot.lane.b32.xlu1 %v4085_v22, %s3970_s25 }
  0x6f   :  { %483 = vperm.xlu0 %3756, %v4142_v29   ;;  %488 = vperm.xlu1 %3757, %v4147_v30  }
  0xa1   :  { %v339_v36 = vpop.permute.xlu0 %338  ;;  %v272_v37 = vpop.permute.xlu1 %271 }
  0xa5   :  { %v4165_v42 = vpop.permute.xlu0 %340  ;;  %v4167_v43 = vpop.permute.xlu1 %273 }
  0xa6   :  { %v376_v44 = vsel %vm364_vm2, %v339_v36, %v4165_v42  ;;  %v312_v45 = vsel %vm299_vm3, %v272_v37, %v4167_v43 }
  0xa7   :  { %v384_v47 = vmul.f32 %v4160_v40, %v376_v44  ;;  %v319_v48 = vmul.f32 %v4163_v41, %v312_v45 }
  0xa9   :  { %v416_v51 = vrot.slane %v384_v47, 6  ;;  %v4183_v52 = vpop.permute.xlu0 %336  ;;  %v4185_v53 = vpop.permute.xlu1 %269  ;;  %v449_v54 = vsel %vm445_vm6, %v319_v48, %v4040_v7  ;;  %v58_v47 = vadd.s32 128, %v4152_v32 }
  0xaa   :  { %v377_v56 = vsel %vm364_vm2, %v4183_v52, %v339_v36  ;;  %v313_v57 = vsel %vm299_vm3, %v4185_v53, %v272_v37 }
  0xab   :  { %v383_v58 = vmul.f32 %v4178_v49, %v377_v56  ;;  %v318_v59 = vmul.f32 %v4181_v50, %v313_v57  ;;  %v466_v60 = vsel %vm462_vm7, %v449_v54, %v416_v51 }
  0xac   :  { %3403 = vmatprep.subr.msk.mxu1 %vm496_vm8, %v466_v60 }
  0xad   :  { %v415_v61 = vrot.slane %v383_v58, 6  ;;  %v347_v62 = vpop.permute.xlu0 %346  ;;  %v4203_v0 = vpop.permute.xlu1 %348  ;;  %v448_v2 = vsel %vm445_vm6, %v318_v59, %v4042_v8  ;;  %v4265_v59 = vsel %vm100_vm15, 1.0, %v5259_v1 }
  0xae   :  { %v372_v4 = vsel %vm364_vm2, %v347_v62, %v4203_v0 }
  0xaf   :  { %v465_v6 = vsel %vm462_vm7, %v448_v2, %v415_v61  ;;  %v388_v7 = vmul.f32 %v4201_v63, %v372_v4  ;;  %v72_v61 = vadd.s32 1920, %v4152_v32 }
  0xb0   :  { %3404 = vmatpush1.msk.msra.mxu1 %vm496_vm8, %v465_v6  ;;  %v4281_v6 = vsel %vm147_vm0, 1.0, %v5259_v1 }
  0xb1   :  { %v280_v12 = vpop.permute.xlu0 %279  ;;  %v4217_v13 = vpop.permute.xlu1 %281  ;;  %3405 = vmatmul.mubr.msk.f32.vlgmr.msra.gmra.mrb[0].mxu1 %vm491_vm11, %v4142_v29  ;;  %v420_v31 = vrot.slane %v388_v7, 6  ;;  %5300 = vst [vmem:[#allocation13_spill] sm:$0xff] %v4281_v6  ;;  %v4284_v7 = vsel %vm99_vm1, 1.0, %v5259_v1  ;;  %v88_v14 = vand.u32 15, %v72_v61 }
  0xb2   :  { %v308_v8 = vsel %vm299_vm3, %v280_v12, %v4217_v13  ;;  %692 = vmatprep.mubr.f32.mxu1 %v5259_v1 }
  0xb3   :  { %v323_v17 = vmul.f32 %v4215_v10, %v308_v8  ;;  %vm4323_vm10 = vcmp.le.s32.totalorder %v88_v14, 14  ;;  %v65_v8 = vadd.s32 1024, %v4152_v32  ;;  %vm4346_vm13 = vcmp.ge.s32.totalorder %v88_v14, 1 }
  0xb5   :  { %v4233_v35 = vpop.permute.xlu0 %344  ;;  %v4235_v36 = vpop.permute.xlu1 %277  ;;  %v453_v37 = vsel %vm445_vm6, %v323_v17, %v4063_v15  ;;  %3406 = vmatmul.mubr.msk.f32.gmra.mrb[2].mxu1 %vm491_vm11, %v4147_v30  ;;  %v71_v17 = vadd.s32 1792, %v4152_v32 }
  0xb6   :  { %v373_v38 = vsel %vm364_vm2, %v4233_v35, %v347_v62  ;;  %v309_v39 = vsel %vm299_vm3, %v4235_v36, %v280_v12  ;;  %v470_v44 = vsel %vm462_vm7, %v453_v37, %v420_v31  ;;  %840 = vmatprep.mubr.f32.mxu1 %v5259_v1 }
  0xb7   :  { %v387_v45 = vmul.f32 %v4228_v33, %v373_v38  ;;  %v322_v15 = vmul.f32 %v4231_v34, %v309_v39  ;;  %3411 = vmatprep.subr.msk.mxu1 %vm496_vm8, %v470_v44  ;;  %v61_v38 = vadd.s32 512, %v4152_v32 }
  0xb9   :  { %v419_v48 = vrot.slane %v387_v45, 6  ;;  %v452_v51 = vsel %vm445_vm6, %v322_v15, %v4071_v18  ;;  %v355_v54 = vpop.permute.xlu0 %354  ;;  %v4258_v56 = vpop.permute.xlu1 %356  ;;  %v74_v18 = vand.u32 15, %v58_v47 }
  0xba   :  { %v368_v57 = vsel %vm364_vm2, %v355_v54, %v4258_v56 }
  0xbb   :  { %v469_v58 = vsel %vm462_vm7, %v452_v51, %v419_v48  ;;  %v392_v60 = vmul.f32 %v4256_v55, %v368_v57  ;;  %vm4286_vm4 = vcmp.le.s32.totalorder %v74_v18, 14  ;;  %vm90_vm5 = vcmp.ge.s32.totalorder %v74_v18, 1 }
  0xbc   :  { %3412 = vmatpush1.msk.msra.mxu1 %vm496_vm8, %v469_v58  ;;  %v4315_v47 = vsel %vm4286_vm4, 1.0, %v5259_v1  ;;  %v4318_v48 = vsel %vm90_vm5, 1.0, %v5259_v1  ;;  %v4321_v51 = vsel %vm137_vm9, 1.0, %v5259_v1  ;;  %v87_v57 = vand.u32 15, %v71_v17 }
  0xbd   :  { %v288_v62 = vpop.permute.xlu0 %287  ;;  %v4270_v2 = vpop.permute.xlu1 %289  ;;  %3413 = vmatmul.mubr.msk.f32.vlgmr.msra.gmra.mrb[4].mxu1 %vm491_vm11, %v4142_v29  ;;  %v424_v12 = vrot.slane %v392_v60, 6 }
  0xbe   :  { %v304_v4 = vsel %vm299_vm3, %v288_v62, %v4270_v2  ;;  %846 = vmatprep.mubr.f32.mxu1 %v5259_v1  ;;  %vm4353_vm14 = vcmp.le.s32.totalorder %v87_v57, 14  ;;  %vm4361_vm15 = vcmp.ge.s32.totalorder %v87_v57, 1 }
  0xbf   :  { %v327_v5 = vmul.f32 %v4265_v59, %v304_v4 }
  0xc1   :  { %v4291_v19 = vpop.permute.xlu0 %352  ;;  %v4293_v31 = vpop.permute.xlu1 %285  ;;  %v457_v37 = vsel %vm445_vm6, %v327_v5, %v4083_v21  ;;  %3414 = vmatmul.mubr.msk.f32.gmra.mrb[6].mxu1 %vm491_vm11, %v4147_v30  ;;  %v62_v21 = vadd.s32 640, %v4152_v32 }
  0xc2   :  { %v369_v39 = vsel %vm364_vm2, %v4291_v19, %v355_v54  ;;  %v305_v44 = vsel %vm299_vm3, %v4293_v31, %v288_v62  ;;  %v474_v45 = vsel %vm462_vm7, %v457_v37, %v424_v12  ;;  %994 = vmatprep.mubr.f32.mxu1 %v5259_v1  ;;  %v77_v62 = vand.u32 15, %v61_v38 }
  0xc3   :  { %v391_v15 = vmul.f32 %v4281_v6, %v369_v39  ;;  %v326_v46 = vmul.f32 %v4284_v7, %v305_v44  ;;  %3419 = vmatprep.subr.msk.mxu1 %vm496_vm8, %v474_v45  ;;  %v78_v12 = vand.u32 15, %v62_v21  ;;  %v4351_v38 = vsel %vm89_vm12, 1.0, %v5259_v1 }
  0xc4   :  { %vm141_vm0 = vcmp.le.s32.totalorder %v77_v62, 14  ;;  %vm4376_vm4 = vcmp.ge.s32.totalorder %v77_v62, 1  ;;  %v4391_v62 = vsel %vm4353_vm14, 1.0, %v5259_v1 }
  0xc5   :  { %v423_v58 = vrot.slane %v391_v15, 6  ;;  %v456_v60 = vsel %vm445_vm6, %v326_v46, %v4091_v23  ;;  %v335_v18 = vpop.permute.xlu0 %334  ;;  %v268_v61 = vpop.permute.xlu1 %267  ;;  %v69_v46 = vadd.s32 1536, %v4152_v32  ;;  %vm4371_vm1 = vcmp.le.s32.totalorder %v78_v12, 14  ;;  %5317 = vst [vmem:[#allocation16_spill] sm:$0xff] %v4391_v62 }
  0xc6   :  { %v378_v4 = vsel %vm364_vm2, %v335_v18, %v4183_v52  ;;  %v314_v5 = vsel %vm299_vm3, %v268_v61, %v4185_v53  ;;  %v4344_v52 = vsel %vm4323_vm10, 1.0, %v5259_v1  ;;  %vm4403_vm5 = vcmp.ge.s32.totalorder %v78_v12, 1 }
  0xc7   :  { %v382_v17 = vmul.f32 %v4315_v47, %v378_v4  ;;  %v317_v37 = vmul.f32 %v4318_v48, %v314_v5  ;;  %v473_v23 = vsel %vm462_vm7, %v456_v60, %v423_v58  ;;  %5305 = vst [vmem:[#allocation14_spill] sm:$0xff] %v4344_v52  ;;  %v81_v4 = vand.u32 15, %v65_v8 }
  0xc8   :  { %3420 = vmatpush1.msk.msra.mxu1 %vm496_vm8, %v473_v23  ;;  %v82_v5 = vand.u32 15, %v66_v3  ;;  %v4396_v8 = vsel %vm4361_vm15, 1.0, %v5259_v1  ;;  %v4401_v3 = vsel %vm141_vm0, 1.0, %v5259_v1  ;;  %v85_v39 = vand.u32 15, %v69_v46 }
  0xc9   :  { %v414_v44 = vrot.slane %v382_v17, 6  ;;  %v333_v45 = vpop.permute.xlu0 %332  ;;  %v363_v21 = vpop.permute.xlu1 %362  ;;  %v447_v15 = vsel %vm445_vm6, %v317_v37, %v4054_v11  ;;  %3421 = vmatmul.mubr.msk.f32.vlgmr.msra.gmra.mrb[8].mxu1 %vm491_vm11, %v4142_v29  ;;  %v4386_v37 = vsel %vm4346_vm13, 1.0, %v5259_v1  ;;  %5318 = vst [vmem:[#allocation17_spill] sm:$0xff] %v4396_v8  ;;  %v4414_v14 = vsel %vm4371_vm1, 1.0, %v5259_v1 }
  0xca   :  { %v379_v54 = vsel %vm364_vm2, %v333_v45, %v335_v18  ;;  %v380_v58 = vsel %vm364_vm2, %v363_v21, %v333_v45  ;;  %1000 = vmatprep.mubr.f32.mxu1 %v5259_v1  ;;  %5316 = vst [vmem:[#allocation15_spill] sm:$0xff] %v4386_v37  ;;  %vm4424_vm9 = vcmp.le.s32.totalorder %v81_v4, 14  ;;  %vm4428_vm10 = vcmp.le.s32.totalorder %v82_v5, 14 }
  0xcb   :  { %v464_v57 = vsel %vm462_vm7, %v447_v15, %v414_v44  ;;  %v381_v18 = vmul.f32 %v4321_v51, %v379_v54  ;;  %v396_v17 = vmul.f32 %v4344_v52, %v380_v58  ;;  %v4419_v54 = vsel %vm4376_vm4, 1.0, %v5259_v1 }
  0xcc   :  { %3399 = vmatprep.subr.msk.mxu0 %vm496_vm8, %v464_v57  ;;  %vm4432_vm12 = vcmp.ge.s32.totalorder %v81_v4, 1  ;;  %vm98_vm13 = vcmp.ge.s32.totalorder %v82_v5, 1  ;;  %vm4445_vm14 = vcmp.le.s32.totalorder %v85_v39, 14  ;;  %v5329_v5 = vmov 0.0  }
  0xcd   :  { %v296_v23 = vpop.permute.xlu0 %295  ;;  %v298_v44 = vpop.permute.xlu1 %297  ;;  %3422 = vmatmul.mubr.msk.f32.gmra.mrb[10].mxu1 %vm491_vm11, %v4147_v30  ;;  %v413_v11 = vrot.slane %v381_v18, 6  ;;  %v428_v57 = vrot.slane %v396_v17, 6  ;;  %v4484_v53 = vsel %vm98_vm13, 1.0, %v5329_v5  ;;  %vm101_vm15 = vcmp.ge.s32.totalorder %v85_v39, 1 }
  0xce   :  { %v300_v45 = vsel %vm299_vm3, %v296_v23, %v298_v44  ;;  %v315_v15 = vsel %vm299_vm3, %v298_v44, %v268_v61  ;;  %1148 = vmatprep.mubr.f32.mxu1 %v5259_v1  ;;  %v70_v44 = vadd.s32 1664, %v4152_v32  ;;  %v4492_v61 = vsel %vm4445_vm14, 1.0, %v5329_v5  ;;  %v3764_v32 = vld [vmem:[#allocation6 + $0x8] sm:$0xff]  }
  0xcf   :  { %v316_v12 = vmul.f32 %v4351_v38, %v315_v15  ;;  %v331_v46 = vmul.f32 %v4386_v37, %v300_v45  ;;  %5332 = vst [vmem:[#allocation20_spill] sm:$0xff] %v4492_v61 }
  0xd1   :  { %v4437_v1 = vpop.permute.xlu0 %360  ;;  %v4439_v15 = vpop.permute.xlu1 %293  ;;  %v446_v45 = vsel %vm445_vm6, %v316_v12, %v4103_v25  ;;  %v461_v52 = vsel %vm445_vm6, %v331_v46, %v4109_v26  ;;  %v86_v46 = vand.u32 15, %v70_v44 }
  0xd2   :  { %v365_v4 = vsel %vm364_vm2, %v4437_v1, %v363_v21  ;;  %v301_v17 = vsel %vm299_vm3, %v4439_v15, %v296_v23  ;;  %v463_v37 = vsel %vm462_vm7, %v446_v45, %v413_v11  ;;  %v478_v25 = vsel %vm462_vm7, %v461_v52, %v428_v57 }
  0xd3   :  { %v395_v12 = vmul.f32 %v4391_v62, %v365_v4  ;;  %v330_v26 = vmul.f32 %v4396_v8, %v301_v17  ;;  %3400 = vmatpush1.msk.msra.mxu0 %vm496_vm8, %v463_v37  ;;  %3427 = vmatprep.subr.msk.mxu1 %vm496_vm8, %v478_v25  ;;  %v4464_v21 = vsel %vm4403_vm5, 1.0, %v5329_v5  ;;  %v4469_v23 = vsel %vm4424_vm9, 1.0, %v5329_v5 }
  0xd4   :  { %5330 = vst [vmem:[#allocation18_spill] sm:$0xff] %v4469_v23  ;;  %3401 = vmatmul.mubr.msk.f32.vlgmr.msra.gmra.mrb[0].mxu0 %vm491_vm11, %v4142_v29  ;;  %v4476_v52 = vsel %vm4428_vm10, 1.0, %v5329_v5  ;;  %v4481_v37 = vsel %vm4432_vm12, 1.0, %v5329_v5  ;;  %vm4513_vm0 = vcmp.le.s32.totalorder %v86_v46, 14  ;;  %vm4517_vm1 = vcmp.ge.s32.totalorder %v86_v46, 1 }
  0xd5   :  { %5331 = vst [vmem:[#allocation19_spill] sm:$0xff] %v4476_v52  ;;  %v427_v58 = vrot.slane %v395_v12, 6  ;;  %v460_v11 = vsel %vm445_vm6, %v330_v26, %v4115_v27  ;;  %v343_v57 = vpop.permute.xlu0 %342  ;;  %v276_v45 = vpop.permute.xlu1 %275  ;;  %615 = vmatprep.mubr.f32.mxu0 %v5329_v5 }
  0xd6   :  { %v374_v60 = vsel %vm364_vm2, %v343_v57, %v4233_v35  ;;  %v375_v44 = vsel %vm364_vm2, %v4165_v42, %v343_v57  ;;  %v310_v27 = vsel %vm299_vm3, %v276_v45, %v4235_v36  ;;  %v311_v4 = vsel %vm299_vm3, %v4167_v43, %v276_v45 }
  0xd7   :  { %v385_v18 = vmul.f32 %v4401_v3, %v375_v44  ;;  %v386_v39 = vmul.f32 %v4414_v14, %v374_v60  ;;  %v320_v17 = vmul.f32 %v4419_v54, %v311_v4  ;;  %v321_v35 = vmul.f32 %v4464_v21, %v310_v27 }
  0xd8   :  { %3402 = vmatmul.mubr.msk.f32.gmra.mrb[2].mxu0 %vm491_vm11, %v4147_v30  ;;  %v477_v42 = vsel %vm462_vm7, %v460_v11, %v427_v58  ;;  %v4522_v43 = vsel %vm101_vm15, 1.0, %v5329_v5 }
  0xd9   :  { %5337 = vst [vmem:[#allocation21_spill] sm:$0xff] %v4522_v43  ;;  %v417_v12 = vrot.slane %v385_v18, 6  ;;  %v418_v26 = vrot.slane %v386_v39, 6  ;;  %v450_v57 = vsel %vm445_vm6, %v320_v17, %v4048_v9  ;;  %3428 = vmatpush1.msk.msra.mxu1 %vm496_vm8, %v477_v42  ;;  %v351_v45 = vpop.permute.xlu0 %350  ;;  %v284_v58 = vpop.permute.xlu1 %283  ;;  %v451_v11 = vsel %vm445_vm6, %v321_v35, %v4077_v20  ;;  %763 = vmatprep.mubr.f32.mxu0 %v5329_v5 }
  0xda   :  { %v370_v46 = vsel %vm364_vm2, %v351_v45, %v4291_v19  ;;  %v371_v60 = vsel %vm364_vm2, %v4203_v0, %v351_v45  ;;  %3429 = vmatmul.mubr.msk.f32.vlgmr.msra.gmra.mrb[12].mxu1 %vm491_vm11, %v4142_v29  ;;  %v306_v9 = vsel %vm299_vm3, %v284_v58, %v4293_v31  ;;  %v307_v20 = vsel %vm299_vm3, %v4217_v13, %v284_v58 }
  0xdb   :  { %v389_v44 = vmul.f32 %v4469_v23, %v371_v60  ;;  %v390_v27 = vmul.f32 %v4476_v52, %v370_v46  ;;  %v324_v19 = vmul.f32 %v4481_v37, %v307_v20  ;;  %v325_v4 = vmul.f32 %v4484_v53, %v306_v9  ;;  %1154 = vmatprep.mubr.f32.mxu1 %v5329_v5 }
  0xdc   :  { %v468_v0 = vsel %vm462_vm7, %v451_v11, %v418_v26  ;;  %v4553_v31 = vsel %vm4513_vm0, 1.0, %v5329_v5  ;;  %v467_v18 = vsel %vm462_vm7, %v450_v57, %v417_v12  ;;  %v4559_v13 = vsel %vm4517_vm1, 1.0, %v5329_v5 }
  0xdd   :  { %5338 = vst [vmem:[#allocation22_spill] sm:$0xff] %v4553_v31  ;;  %5339 = vst [vmem:[#allocation23_spill] sm:$0xff] %v4559_v13  ;;  %v421_v39 = vrot.slane %v389_v44, 6  ;;  %v422_v17 = vrot.slane %v390_v27, 6  ;;  %v454_v35 = vsel %vm445_vm6, %v324_v19, %v4065_v16  ;;  %3407 = vmatprep.subr.msk.mxu0 %vm496_vm8, %v468_v0  ;;  %v359_v42 = vpop.permute.xlu0 %358  ;;  %v292_v26 = vpop.permute.xlu1 %291  ;;  %v455_v25 = vsel %vm445_vm6, %v325_v4, %v4097_v24 }
  0xde   :  { %v366_v12 = vsel %vm364_vm2, %v359_v42, %v4437_v1  ;;  %v367_v36 = vsel %vm364_vm2, %v4258_v56, %v359_v42  ;;  %3408 = vmatpush1.msk.msra.mxu0 %vm496_vm8, %v467_v18  ;;  %3430 = vmatmul.mubr.msk.f32.gmra.mrb[14].mxu1 %vm491_vm11, %v4147_v30  ;;  %v302_v16 = vsel %vm299_vm3, %v292_v26, %v4439_v15 }
  0xdf   :  { %v393_v57 = vmul.f32 %v4492_v61, %v367_v36  ;;  %v394_v24 = vmul.f32 %v4553_v31, %v366_v12  ;;  %v303_v1 = vsel %vm299_vm3, %v4270_v2, %v292_v26  ;;  %v329_v45 = vmul.f32 %v4559_v13, %v302_v16  ;;  %3409 = vmatmul.mubr.msk.f32.vlgmr.msra.gmra.mrb[4].mxu0 %vm491_vm11, %v4142_v29 }
  0xe0   :  { %v328_v56 = vmul.f32 %v4522_v43, %v303_v1  ;;  %v472_v58 = vsel %vm462_vm7, %v455_v25, %v422_v17  ;;  %769 = vmatprep.mubr.f32.mxu0 %v5329_v5  ;;  %v471_v15 = vsel %vm462_vm7, %v454_v35, %v421_v39 }
  0xe1   :  { %v426_v11 = vrot.slane %v394_v24, 6  ;;  %3415 = vmatprep.subr.msk.mxu0 %vm496_vm8, %v472_v58  ;;  %v459_v46 = vsel %vm445_vm6, %v329_v45, %v4121_v28  ;;  %v425_v2 = vrot.slane %v393_v57, 6 }
  0xe2   :  { %3416 = vmatpush1.msk.msra.mxu0 %vm496_vm8, %v471_v15  ;;  %v458_v9 = vsel %vm445_vm6, %v328_v56, %v4085_v22  ;;  %vm1512_vm6 = vcmask 392192  }
  0xe3   :  { %3410 = vmatmul.mubr.msk.f32.gmra.mrb[6].mxu0 %vm491_vm11, %v4147_v30  ;;  %v476_v60 = vsel %vm462_vm7, %v459_v46, %v426_v11  ;;  %v475_v28 = vsel %vm462_vm7, %v458_v9, %v425_v2 }
  0xe4   :  { %3423 = vmatprep.subr.msk.mxu0 %vm496_vm8, %v476_v60  ;;  %917 = vmatprep.mubr.f32.mxu0 %v5329_v5 }
  0xe7   :  { %3417 = vmatmul.mubr.msk.f32.vlgmr.msra.gmra.mrb[8].mxu0 %vm491_vm11, %v4142_v29 }
  0xe8   :  { %3424 = vmatpush1.msk.msra.mxu0 %vm496_vm8, %v475_v28  ;;  %923 = vmatprep.mubr.f32.mxu0 %v5329_v5 }
  0xeb   :  { %3418 = vmatmul.mubr.msk.f32.gmra.mrb[10].mxu0 %vm491_vm11, %v4147_v30 }
  0xec   :  { %1071 = vmatprep.mubr.f32.mxu0 %v5329_v5 }
  0xee   :  { %v4614_v22 = vpop.permute.xlu0 %483  ;;  %v4617_v19 = vpop.permute.xlu1 %488 }
  0xef   :  { %3425 = vmatmul.mubr.msk.f32.vlgmr.msra.gmra.mrb[12].mxu0 %vm491_vm11, %v4142_v29 }
  0xf0   :  { %1077 = vmatprep.mubr.f32.mxu0 %v5329_v5 }
  0xf3   :  { %3426 = vmatmul.mubr.msk.f32.gmra.mrb[14].mxu0 %vm491_vm11, %v4147_v30 }
 0x184   :  { %v688_v20 = vpop.f32.mrb[0].mxu1 }
 0x185   :  { %v690_v44 = vpop.f32.mrb[1].mxu1  ;;  %v689_v27 = vadd.f32 %v688_v20, %v4614_v22 }
 0x187   :  { %v4619_v18 = vmax.f32 %v689_v27, 0.0 }
 0x188   :  { %v694_v4 = vpop.f32.mrb[2].mxu1 }
 0x189   :  { %v696_v0 = vpop.f32.mrb[3].mxu1  ;;  %v695_v39 = vadd.f32 %v694_v4, %v4617_v19 }
 0x18b   :  { %v4622_v29 = vmax.f32 %v695_v39, 0.0 }
 0x190   :  { %v4626_v30 = vpop.f32.mrb[4].mxu1 }
 0x191   :  { %v4628_v17 = vpop.f32.mrb[5].mxu1 }
 0x194   :  { %v4630_v35 = vpop.f32.mrb[6].mxu1 }
 0x195   :  { %v4632_v42 = vpop.f32.mrb[7].mxu1  ;;  %v849_v13 = vadd.f32 %v4630_v35, %v4617_v19 }
 0x197   :  { %v4770_v55 = vmax.f32 %v849_v13, 0.0 }
 0x19c   :  { %v4634_v26 = vpop.f32.mrb[8].mxu1 }
 0x19d   :  { %v4636_v25 = vpop.f32.mrb[9].mxu1  ;;  %v997_v35 = vadd.f32 %v4634_v26, %v4614_v22 }
 0x1a0   :  { %v4638_v12 = vpop.f32.mrb[10].mxu1 }
 0x1a1   :  { %v4640_v36 = vpop.f32.mrb[11].mxu1 }
 0x1a7   :  { %v611_v16 = vpop.f32.mrb[0].mxu0 }
 0x1a8   :  { %v612_v57 = vadd.f32 %v611_v16, %v4614_v22  ;;  %v613_v24 = vpop.f32.mrb[1].mxu0 }
 0x1a9   :  { %v614_v45 = vadd.f32 %v613_v24, %v4614_v22 }
 0x1aa   :  { %v4643_v1 = vmax.f32 %v612_v57, 0.0 }
 0x1ab   :  { %v617_v56 = vpop.f32.mrb[2].mxu0  ;;  %v4654_v9 = vmax.f32 %v614_v45, 0.0 }
 0x1ac   :  { %v618_v58 = vadd.f32 %v617_v56, %v4617_v19  ;;  %v619_v15 = vpop.f32.mrb[3].mxu0  ;;  %1193 = vrot.lane.b32.xlu1 %v4643_v1, %s3970_s25 }
 0x1ad   :  { %v620_v11 = vadd.f32 %v619_v15, %v4617_v19  ;;  %v4650_v46 = vpop.f32.mrb[12].mxu1 }
 0x1ae   :  { %v4652_v2 = vmax.f32 %v618_v58, 0.0  ;;  %v1152_v60 = vpop.f32.mrb[13].mxu1  ;;  %v691_v58 = vadd.f32 %v690_v44, %v4614_v22 }
 0x1af   :  { %v4656_v28 = vmax.f32 %v620_v11, 0.0 }
 0x1b0   :  { %1201 = vrot.lane.b32.xlu1 %v4619_v18, %s3970_s25  ;;  %1195 = vrot.lane.b32.xlu0 %v4652_v2, %s3970_s25  ;;  %v4689_v62 = vmax.f32 %v691_v58, 0.0 }
 0x1b1   :  { %v4664_v27 = vpop.f32.mrb[14].mxu1 }
 0x1b2   :  { %v765_v39 = vpop.f32.mrb[4].mxu0  ;;  %v1158_v16 = vpop.f32.mrb[15].mxu1 }
 0x1b3   :  { %v767_v57 = vpop.f32.mrb[5].mxu0  ;;  %v766_v24 = vadd.f32 %v765_v39, %v4614_v22 }
 0x1b4   :  { %1329 = vrot.lane.b32.xlu1 %v4619_v18, %s3969_s4  ;;  %1203 = vrot.lane.b32.xlu0 %v4622_v29, %s3970_s25  ;;  %v768_v45 = vadd.f32 %v767_v57, %v4614_v22 }
 0x1b5   :  { %v4681_v4 = vmax.f32 %v766_v24, 0.0 }
 0x1b6   :  { %v771_v56 = vpop.f32.mrb[6].mxu0  ;;  %v4685_v39 = vmax.f32 %v768_v45, 0.0  ;;  %v1153_v45 = vadd.f32 %v1152_v60, %v4614_v22  ;;  %v1159_v60 = vadd.f32 %v1158_v16, %v4617_v19  ;;  %v5273_v16 = vmov 0  }
 0x1b7   :  { %v772_v15 = vadd.f32 %v771_v56, %v4617_v19  ;;  %v773_v11 = vpop.f32.mrb[7].mxu0  ;;  %v697_v56 = vadd.f32 %v696_v0, %v4617_v19  ;;  %1548 = vmatprep.mubr.bf16.mxu0 %v5273_v16  ;;  %1591 = vmatprep.mubr.bf16.mxu1 %v5273_v16  ;;  %v845_v16 = vadd.f32 %v4628_v17, %v4614_v22 }
 0x1b8   :  { %v774_v20 = vadd.f32 %v773_v11, %v4617_v19  ;;  %1197 = vrot.lane.b32.xlu1 %v4654_v9, %s3970_s25  ;;  %1331 = vrot.lane.b32.xlu0 %v4622_v29, %s3969_s4  ;;  %v4713_v24 = vmax.f32 %v1153_v45, 0.0 }
 0x1b9   :  { %v4683_v5 = vmax.f32 %v772_v15, 0.0  ;;  %v4702_v15 = vmax.f32 %v697_v56, 0.0  ;;  %v4768_v43 = vmax.f32 %v845_v16, 0.0 }
 0x1ba   :  { %v4687_v57 = vmax.f32 %v774_v20, 0.0  ;;  %v919_v44 = vpop.f32.mrb[8].mxu0  ;;  %5340 = vst [vmem:[#allocation24_spill] sm:$0xff] %v4713_v24 }
 0x1bb   :  { %v921_v31 = vpop.f32.mrb[9].mxu0  ;;  %v920_v20 = vadd.f32 %v919_v44, %v4614_v22 }
 0x1bc   :  { %1205 = vrot.lane.b32.xlu1 %v4689_v62, %s3970_s25  ;;  %1199 = vrot.lane.b32.xlu0 %v4656_v28, %s3970_s25  ;;  %v922_v13 = vadd.f32 %v921_v31, %v4614_v22  ;;  %v4808_v31 = vmax.f32 %v997_v35, 0.0 }
 0x1bd   :  { %v4709_v61 = vmax.f32 %v920_v20, 0.0  ;;  %v4726_v20 = vmax.f32 %v1159_v60, 0.0  ;;  %v843_v60 = vadd.f32 %v4626_v30, %v4614_v22  ;;  %v851_v30 = vadd.f32 %v4632_v42, %v4617_v19 }
 0x1be   :  { %v925_v58 = vpop.f32.mrb[10].mxu0  ;;  %v4801_v42 = vmax.f32 %v922_v13, 0.0  ;;  %5342 = vst [vmem:[#allocation26_spill] sm:$0xff] %v4808_v31  ;;  %v1005_v13 = vadd.f32 %v4640_v36, %v4617_v19 }
 0x1bf   :  { %v926_v0 = vadd.f32 %v925_v58, %v4617_v19  ;;  %v927_v11 = vpop.f32.mrb[11].mxu0  ;;  %5341 = vst [vmem:[#allocation25_spill] sm:$0xff] %v4726_v20  ;;  %v4756_v56 = vmax.f32 %v843_v60, 0.0  ;;  %v4776_v17 = vmax.f32 %v851_v30, 0.0  ;;  %v999_v60 = vadd.f32 %v4636_v25, %v4614_v22 }
 0x1c0   :  { %1325 = vrot.lane.b32.xlu1 %v4654_v9, %s3969_s4  ;;  %1207 = vrot.lane.b32.xlu0 %v4702_v15, %s3970_s25  ;;  %v928_v16 = vadd.f32 %v927_v11, %v4617_v19  ;;  %v1003_v30 = vadd.f32 %v4638_v12, %v4617_v19  ;;  %v4830_v25 = vmax.f32 %v1005_v13, 0.0 }
 0x1c1   :  { %v4711_v8 = vmax.f32 %v926_v0, 0.0  ;;  %v4820_v26 = vmax.f32 %v999_v60, 0.0  ;;  %v1157_v60 = vadd.f32 %v4664_v27, %v4617_v19 }
 0x1c2   :  { %v4716_v44 = vpop.f32.mrb[12].mxu0  ;;  %v4814_v6 = vmax.f32 %v928_v16, 0.0  ;;  %v4822_v11 = vmax.f32 %v1003_v30, 0.0  ;;  %5345 = vst [vmem:[#allocation29_spill] sm:$0xff] %v4830_v25 }
 0x1c3   :  { %v4720_v58 = vpop.f32.mrb[13].mxu0  ;;  %5343 = vst [vmem:[#allocation27_spill] sm:$0xff] %v4820_v26  ;;  %v1074_v12 = vadd.f32 %v4716_v44, %v4614_v22  ;;  %v4874_v13 = vmax.f32 %v1157_v60, 0.0 }
 0x1c4   :  { %1253 = vrot.lane.b32.xlu1 %v4713_v24, %s3970_s25  ;;  %1327 = vrot.lane.b32.xlu0 %v4656_v28, %s3969_s4  ;;  %5344 = vst [vmem:[#allocation28_spill] sm:$0xff] %v4822_v11  ;;  %v1076_v44 = vadd.f32 %v4720_v58, %v4614_v22 }
 0x1c5   :  { %v4846_v36 = vmax.f32 %v1074_v12, 0.0  ;;  %5350 = vst [vmem:[#allocation34_spill] sm:$0xff] %v4874_v13 }
 0x1c6   :  { %v4728_v0 = vpop.f32.mrb[14].mxu0  ;;  %v4866_v30 = vmax.f32 %v1076_v44, 0.0  ;;  %v3973_v44 = vmov 4  }
 0x1c7   :  { %v4730_v45 = vpop.f32.mrb[15].mxu0  ;;  %5346 = vst [vmem:[#allocation30_spill] sm:$0xff] %v4846_v36  ;;  %v1080_v35 = vadd.f32 %v4728_v0, %v4617_v19  ;;  %v1151_v0 = vadd.f32 %v4650_v46, %v4614_v22  ;;  %3759 = vset.pattern.permute.xlu0 %v3973_v44  ;;  %3758 = vset.pattern.permute.xlu1 %v3973_v44 }
 0x1c8   :  { %1321 = vrot.lane.b32.xlu1 %v4643_v1, %s3969_s4  ;;  %1255 = vrot.lane.b32.xlu0 %v4726_v20, %s3970_s25  ;;  %5348 = vst [vmem:[#allocation32_spill] sm:$0xff] %v4866_v30  ;;  %v1082_v12 = vadd.f32 %v4730_v45, %v4617_v19 }
 0x1c9   :  { %v4856_v16 = vmax.f32 %v1080_v35, 0.0  ;;  %v4872_v58 = vmax.f32 %v1151_v0, 0.0 }
 0x1ca   :  { %v4882_v22 = vmax.f32 %v1082_v12, 0.0  ;;  %v3889_v12 = vld [vmem:[%s5253_s1] sm:$0xff] }
 0x1cb   :  { %5347 = vst [vmem:[#allocation31_spill] sm:$0xff] %v4856_v16  ;;  %5349 = vst [vmem:[#allocation33_spill] sm:$0xff] %v4872_v58 }
 0x1cc   :  { %1333 = vrot.lane.b32.xlu1 %v4689_v62, %s3969_s4  ;;  %1323 = vrot.lane.b32.xlu0 %v4652_v2, %s3969_s4  ;;  %5351 = vst [vmem:[#allocation35_spill] sm:$0xff] %v4882_v22 }
 0x1d0   :  { %1337 = vrot.lane.b32.xlu1 %v4681_v4, %s3969_s4  ;;  %1335 = vrot.lane.b32.xlu0 %v4702_v15, %s3969_s4 }
 0x1d4   :  { %1209 = vrot.lane.b32.xlu1 %v4681_v4, %s3970_s25  ;;  %1339 = vrot.lane.b32.xlu0 %v4683_v5, %s3969_s4 }
 0x1d8   :  { %1213 = vrot.lane.b32.xlu1 %v4685_v39, %s3970_s25  ;;  %1211 = vrot.lane.b32.xlu0 %v4683_v5, %s3970_s25 }
 0x1dc   :  { %1217 = vrot.lane.b32.xlu1 %v4756_v56, %s3970_s25  ;;  %1215 = vrot.lane.b32.xlu0 %v4687_v57, %s3970_s25 }
 0x1e0   :  { %1221 = vrot.lane.b32.xlu1 %v4768_v43, %s3970_s25  ;;  %1219 = vrot.lane.b32.xlu0 %v4770_v55, %s3970_s25 }
 0x1e4   :  { %1341 = vrot.lane.b32.xlu1 %v4685_v39, %s3969_s4  ;;  %1223 = vrot.lane.b32.xlu0 %v4776_v17, %s3970_s25 }
 0x1e8   :  { %1345 = vrot.lane.b32.xlu1 %v4756_v56, %s3969_s4  ;;  %1343 = vrot.lane.b32.xlu0 %v4687_v57, %s3969_s4 }
 0x1ec   :  { %1349 = vrot.lane.b32.xlu1 %v4768_v43, %s3969_s4  ;;  %1347 = vrot.lane.b32.xlu0 %v4770_v55, %s3969_s4 }
 0x1f0   :  { %1353 = vrot.lane.b32.xlu1 %v4709_v61, %s3969_s4  ;;  %1351 = vrot.lane.b32.xlu0 %v4776_v17, %s3969_s4 }
 0x1f4   :  { %1225 = vrot.lane.b32.xlu1 %v4709_v61, %s3970_s25  ;;  %1355 = vrot.lane.b32.xlu0 %v4711_v8, %s3969_s4 }
 0x1f8   :  { %1229 = vrot.lane.b32.xlu1 %v4801_v42, %s3970_s25  ;;  %1227 = vrot.lane.b32.xlu0 %v4711_v8, %s3970_s25 }
 0x1fc   :  { %1233 = vrot.lane.b32.xlu1 %v4808_v31, %s3970_s25  ;;  %1231 = vrot.lane.b32.xlu0 %v4814_v6, %s3970_s25 }
 0x200   :  { %1237 = vrot.lane.b32.xlu1 %v4820_v26, %s3970_s25  ;;  %1235 = vrot.lane.b32.xlu0 %v4822_v11, %s3970_s25 }
 0x204   :  { %1357 = vrot.lane.b32.xlu1 %v4801_v42, %s3969_s4  ;;  %1239 = vrot.lane.b32.xlu0 %v4830_v25, %s3970_s25 }
 0x208   :  { %1361 = vrot.lane.b32.xlu1 %v4808_v31, %s3969_s4  ;;  %1359 = vrot.lane.b32.xlu0 %v4814_v6, %s3969_s4 }
 0x20c   :  { %1365 = vrot.lane.b32.xlu1 %v4820_v26, %s3969_s4  ;;  %1363 = vrot.lane.b32.xlu0 %v4822_v11, %s3969_s4 }
 0x210   :  { %1369 = vrot.lane.b32.xlu1 %v4846_v36, %s3969_s4  ;;  %1367 = vrot.lane.b32.xlu0 %v4830_v25, %s3969_s4 }
 0x214   :  { %1241 = vrot.lane.b32.xlu1 %v4846_v36, %s3970_s25  ;;  %1371 = vrot.lane.b32.xlu0 %v4856_v16, %s3969_s4 }
 0x218   :  { %1245 = vrot.lane.b32.xlu1 %v4866_v30, %s3970_s25  ;;  %1243 = vrot.lane.b32.xlu0 %v4856_v16, %s3970_s25 }
 0x21c   :  { %1249 = vrot.lane.b32.xlu1 %v4872_v58, %s3970_s25  ;;  %1251 = vrot.lane.b32.xlu0 %v4874_v13, %s3970_s25 }
 0x21e   :  { %v1194_v46 = vpop.permute.xlu1 %1193 }
 0x220   :  { %1373 = vrot.lane.b32.xlu1 %v4866_v30, %s3969_s4  ;;  %1247 = vrot.lane.b32.xlu0 %v4882_v22, %s3970_s25 }
 0x222   :  { %v1196_v27 = vpop.permute.xlu0 %1195  ;;  %v1202_v35 = vpop.permute.xlu1 %1201 }
 0x224   :  { %1377 = vrot.lane.b32.xlu1 %v4872_v58, %s3969_s4  ;;  %1379 = vrot.lane.b32.xlu0 %v4874_v13, %s3969_s4 }
 0x226   :  { %v1204_v19 = vpop.permute.xlu0 %1203  ;;  %v4892_v45 = vpop.permute.xlu1 %1329 }
 0x228   :  { %1381 = vrot.lane.b32.xlu1 %v4713_v24, %s3969_s4  ;;  %1375 = vrot.lane.b32.xlu0 %v4882_v22, %s3969_s4 }
 0x22a   :  { %v1332_v0 = vpop.permute.xlu0 %1331  ;;  %v1198_v60 = vpop.permute.xlu1 %1197 }
 0x22b   :  { %v1285_v44 = vsel %vm299_vm3, %v1194_v46, %v1198_v60  ;;  %v1283_v24 = vsel %vm299_vm3, %v1198_v60, %v1202_v35 }
 0x22c   :  { %1383 = vrot.lane.b32.xlu0 %v4726_v20, %s3969_s4  ;;  %1500 = vperm.xlu1 %3758, %v3889_v12   ;;  %v1290_v58 = vmul.f32 %v4318_v48, %v1285_v44  ;;  %v3890_v12 = vld [vmem:[%s5253_s1 + $0x8] sm:$0xff] }
 0x22e   :  { %v1200_v16 = vpop.permute.xlu0 %1199  ;;  %v4905_v36 = vpop.permute.xlu1 %1205 }
 0x22f   :  { %v1286_v13 = vsel %vm299_vm3, %v1196_v27, %v1200_v16  ;;  %v1284_v22 = vsel %vm299_vm3, %v1200_v16, %v1204_v19  ;;  %v1281_v20 = vsel %vm299_vm3, %v1202_v35, %v4905_v36 }
 0x230   :  { %v1306_v30 = vmul.f32 %v4318_v48, %v1286_v13  ;;  %1504 = vperm.xlu0 %3759, %v3890_v12   ;;  %v1307_v11 = vmul.f32 %v4181_v50, %v1284_v22  ;;  %v1292_v16 = vmul.f32 %v4163_v41, %v1281_v20  ;;  %v1291_v12 = vmul.f32 %v4181_v50, %v1283_v24 }
 0x232   :  { %v1208_v52 = vpop.permute.xlu0 %1207  ;;  %v1326_v23 = vpop.permute.xlu1 %1325  ;;  %v1450_v44 = vpack.c.bf16 %v1306_v30, %v1290_v58  ;;  %v1451_v35 = vpack.c.bf16 %v1307_v11, %v1291_v12  ;;  %v1468_v30 = vpack.c.bf16 %v4702_v15, %v4689_v62  ;;  %v5352_v15 = vpack.c.bf16 %v4622_v29, %v4619_v18 }
 0x233   :  { %v1282_v48 = vsel %vm299_vm3, %v1204_v19, %v1208_v52  ;;  %v1411_v11 = vsel %vm364_vm2, %v1326_v23, %v4892_v45  ;;  %v5353_v29 = vpack.c.bf16 %v4656_v28, %v4654_v9 }
 0x234   :  { %v1308_v13 = vmul.f32 %v4163_v41, %v1282_v48  ;;  %1516 = vmatprep.subr.bf16.mxu0 %v1450_v44 }
 0x236   :  { %v1328_v31 = vpop.permute.xlu0 %1327  ;;  %v4927_v25 = vpop.permute.xlu1 %1253  ;;  %v1452_v26 = vpack.c.bf16 %v1308_v13, %v1292_v16 }
 0x237   :  { %v1287_v58 = vsel %vm299_vm3, %v4927_v25, %v1194_v46  ;;  %v1412_v24 = vsel %vm364_vm2, %v1328_v31, %v1332_v0 }
 0x238   :  { %1559 = vmatprep.subr.bf16.mxu1 %v1452_v26  ;;  %v1289_v26 = vmul.f32 %v4351_v38, %v1287_v58 }
 0x239   :  { %1560 = vmatpush1.bf16.msra.mxu1 %v1451_v35 }
 0x23a   :  { %v4934_v20 = vpop.permute.xlu0 %1255  ;;  %1561 = vmatprep.subr.bf16.mxu1 %v1468_v30  ;;  %v4936_v41 = vpop.permute.xlu1 %1321 }
 0x23b   :  { %v1288_v50 = vsel %vm299_vm3, %v4934_v20, %v1196_v27  ;;  %v1434_v27 = vmul.f32 %v4315_v47, %v1412_v24  ;;  %v1413_v18 = vsel %vm364_vm2, %v4936_v41, %v1326_v23 }
 0x23c   :  { %v1305_v62 = vmul.f32 %v4351_v38, %v1288_v50  ;;  %v1418_v38 = vmul.f32 %v4315_v47, %v1411_v11  ;;  %v1417_v12 = vmul.f32 %v4321_v51, %v1413_v18  ;;  %v5354_v47 = vpack.c.bf16 %v4652_v2, %v4643_v1  ;;  %v4985_v1 = vld [vmem:[%s5254_s2] sm:$0xff]  }
 0x23d   :  { %1562 = vmatpush1.bf16.msra.mxu1 %v5352_v15  ;;  %v5355_v11 = vmov 0  }
 0x23e   :  { %v1449_v22 = vpack.c.bf16 %v1305_v62, %v1289_v26  ;;  %v4951_v46 = vpop.permute.xlu0 %1323  ;;  %v1334_v19 = vpop.permute.xlu1 %1333  ;;  %v1482_v13 = vpack.c.bf16 %v1434_v27, %v1418_v38 }
 0x23f   :  { %v1414_v60 = vsel %vm364_vm2, %v4951_v46, %v1328_v31  ;;  %v1409_v28 = vsel %vm364_vm2, %v4892_v45, %v1334_v19 }
 0x240   :  { %1517 = vmatpush1.bf16.msra.mxu0 %v1449_v22  ;;  %v1433_v44 = vmul.f32 %v4321_v51, %v1414_v60  ;;  %v1419_v45 = vmul.f32 %v4178_v49, %v1409_v28 }
 0x241   :  { %1518 = vmatprep.subr.bf16.mxu0 %v5353_v29 }
 0x242   :  { %v1336_v48 = vpop.permute.xlu0 %1335  ;;  %v4965_v16 = vpop.permute.xlu1 %1337  ;;  %v1481_v9 = vpack.c.bf16 %v1433_v44, %v1417_v12 }
 0x243   :  { %v1410_v31 = vsel %vm364_vm2, %v1332_v0, %v1336_v48  ;;  %v1407_v23 = vsel %vm364_vm2, %v1334_v19, %v4965_v16 }
 0x244   :  { %1519 = vmatpush1.bf16.msra.mxu0 %v5354_v47  ;;  %v1435_v51 = vmul.f32 %v4178_v49, %v1410_v31  ;;  %v1420_v2 = vmul.f32 %v4160_v40, %v1407_v23  ;;  %v5356_v31 = vpack.c.bf16 %v4687_v57, %v4685_v39 }
 0x245   :  { %1520 = vmatprep.subr.bf16.mxu0 %v1482_v13 }
 0x246   :  { %v1340_v35 = vpop.permute.xlu0 %1339  ;;  %v1210_v30 = vpop.permute.xlu1 %1209  ;;  %v1483_v62 = vpack.c.bf16 %v1435_v51, %v1419_v45 }
 0x247   :  { %v1408_v0 = vsel %vm364_vm2, %v1336_v48, %v1340_v35  ;;  %v1279_v49 = vsel %vm299_vm3, %v4905_v36, %v1210_v30 }
 0x248   :  { %v1436_v58 = vmul.f32 %v4160_v40, %v1408_v0  ;;  %1521 = vmatpush1.bf16.msra.mxu0 %v1481_v9  ;;  %v1293_v18 = vmul.f32 %v4419_v54, %v1279_v49  ;;  %v5357_v0 = vpack.c.bf16 %v4683_v5, %v4681_v4 }
 0x24a   :  { %v1212_v50 = vpop.permute.xlu0 %1211  ;;  %v1214_v24 = vpop.permute.xlu1 %1213  ;;  %v1484_v26 = vpack.c.bf16 %v1436_v58, %v1420_v2 }
 0x24b   :  { %3432 = vmatmul.mubr.msk.bf16.vlgmr.msra.gmra.mrb[16].mxu0 %vm1512_vm6, %v4985_v1  ;;  %v1280_v15 = vsel %vm299_vm3, %v1208_v52, %v1212_v50  ;;  %v1277_v40 = vsel %vm299_vm3, %v1210_v30, %v1214_v24 }
 0x24c   :  { %1563 = vmatprep.subr.bf16.mxu1 %v1484_v26  ;;  %1634 = vmatprep.mubr.bf16.mxu0 %v5355_v11  ;;  %v1309_v27 = vmul.f32 %v4419_v54, %v1280_v15  ;;  %v1294_v52 = vmul.f32 %v4464_v21, %v1277_v40  ;;  %v1471_v26 = vpack.c.bf16 %v4770_v55, %v4756_v56 }
 0x24d   :  { %1564 = vmatpush1.bf16.msra.mxu1 %v1483_v62 }
 0x24e   :  { %v1216_v22 = vpop.permute.xlu0 %1215  ;;  %v1218_v19 = vpop.permute.xlu1 %1217  ;;  %v1453_v48 = vpack.c.bf16 %v1309_v27, %v1293_v18 }
 0x24f   :  { %v1278_v60 = vsel %vm299_vm3, %v1212_v50, %v1216_v22  ;;  %v1275_v12 = vsel %vm299_vm3, %v1214_v24, %v1218_v19  ;;  %v1472_v50 = vpack.c.bf16 %v4776_v17, %v4768_v43 }
 0x250   :  { %v1310_v38 = vmul.f32 %v4464_v21, %v1278_v60  ;;  %3433 = vmatmul.mubr.msk.bf16.vlgmr.msra.gmra.mrb[16].mxu1 %vm1512_vm6, %v4985_v1  ;;  %v1295_v51 = vmul.f32 %v4231_v34, %v1275_v12 }
 0x251   :  { %1677 = vmatprep.mubr.bf16.mxu1 %v5355_v11 }
 0x252   :  { %v1220_v29 = vpop.permute.xlu0 %1219  ;;  %v5009_v36 = vpop.permute.xlu1 %1221  ;;  %v1454_v44 = vpack.c.bf16 %v1310_v38, %v1294_v52 }
 0x253   :  { %v1276_v13 = vsel %vm299_vm3, %v1216_v22, %v1220_v29  ;;  %v1273_v21 = vsel %vm299_vm3, %v1218_v19, %v5009_v36 }
 0x254   :  { %1602 = vmatprep.subr.bf16.mxu0 %v1454_v44  ;;  %v1311_v23 = vmul.f32 %v4231_v34, %v1276_v13  ;;  %v1296_v28 = vmul.f32 %v4215_v10, %v1273_v21 }
 0x255   :  { %1603 = vmatpush1.bf16.msra.mxu0 %v1453_v48 }
 0x256   :  { %v1224_v54 = vpop.permute.xlu0 %1223  ;;  %1604 = vmatprep.subr.bf16.mxu0 %v5356_v31  ;;  %v1342_v47 = vpop.permute.xlu1 %1341  ;;  %v1455_v57 = vpack.c.bf16 %v1311_v23, %v1295_v51 }
 0x257   :  { %v1274_v9 = vsel %vm299_vm3, %v1220_v29, %v1224_v54  ;;  %v1405_v34 = vsel %vm364_vm2, %v4965_v16, %v1342_v47 }
 0x258   :  { %v1312_v30 = vmul.f32 %v4215_v10, %v1274_v9  ;;  %v1421_v62 = vmul.f32 %v4401_v3, %v1405_v34 }
 0x259   :  { %1605 = vmatpush1.bf16.msra.mxu0 %v5357_v0 }
 0x25a   :  { %v1344_v2 = vpop.permute.xlu0 %1343  ;;  %v1346_v58 = vpop.permute.xlu1 %1345  ;;  %v1456_v39 = vpack.c.bf16 %v1312_v30, %v1296_v28 }
 0x25b   :  { %v1406_v45 = vsel %vm364_vm2, %v1340_v35, %v1344_v2  ;;  %v1403_v10 = vsel %vm364_vm2, %v1342_v47, %v1346_v58 }
 0x25c   :  { %1645 = vmatprep.subr.bf16.mxu1 %v1456_v39  ;;  %v1437_v24 = vmul.f32 %v4401_v3, %v1406_v45  ;;  %v1422_v43 = vmul.f32 %v4414_v14, %v1403_v10  ;;  %v5358_v10 = vpack.c.bf16 %v4711_v8, %v4709_v61 }
 0x25d   :  { %1646 = vmatpush1.bf16.msra.mxu1 %v1455_v57 }
 0x25e   :  { %v1348_v5 = vpop.permute.xlu0 %1347  ;;  %1647 = vmatprep.subr.bf16.mxu1 %v1472_v50  ;;  %v1350_v4 = vpop.permute.xlu1 %1349  ;;  %v1485_v49 = vpack.c.bf16 %v1437_v24, %v1421_v62  ;;  %v5361_v62 = vld [vmem:[#allocation26_spill] sm:$0xff] }
 0x25f   :  { %v1404_v35 = vsel %vm364_vm2, %v1344_v2, %v1348_v5  ;;  %v1474_v2 = vpack.c.bf16 %v4814_v6, %v4801_v42 }
 0x260   :  { %v1438_v17 = vmul.f32 %v4414_v14, %v1404_v35  ;;  %v1401_v14 = vsel %vm364_vm2, %v1346_v58, %v1350_v4 }
 0x261   :  { %1648 = vmatpush1.bf16.msra.mxu1 %v1471_v26  ;;  %v1423_v38 = vmul.f32 %v4228_v33, %v1401_v14  ;;  %v5359_v26 = vld [vmem:[#allocation27_spill] sm:$0xff] }
 0x262   :  { %v1352_v15 = vpop.permute.xlu0 %1351  ;;  %v5047_v16 = vpop.permute.xlu1 %1353  ;;  %v1486_v40 = vpack.c.bf16 %v1438_v17, %v1422_v43  ;;  %v5360_v43 = vld [vmem:[#allocation29_spill] sm:$0xff]  ;;  %v5364_v14 = vld [vmem:[#allocation19_spill] sm:$0xff] }
 0x263   :  { %v1402_v22 = vsel %vm364_vm2, %v1348_v5, %v1352_v15  ;;  %v1399_v55 = vsel %vm364_vm2, %v1350_v4, %v5047_v16  ;;  %v1476_v17 = vpack.c.bf16 %v5360_v43, %v5359_v26 }
 0x264   :  { %1606 = vmatprep.subr.bf16.mxu0 %v1486_v40  ;;  %v1439_v19 = vmul.f32 %v4228_v33, %v1402_v22  ;;  %v1424_v60 = vmul.f32 %v4201_v63, %v1399_v55 }
 0x265   :  { %1607 = vmatpush1.bf16.msra.mxu0 %v1485_v49  ;;  %v5363_v49 = vld [vmem:[#allocation18_spill] sm:$0xff] }
 0x266   :  { %v1356_v56 = vpop.permute.xlu0 %1355  ;;  %v1226_v3 = vpop.permute.xlu1 %1225  ;;  %v1487_v48 = vpack.c.bf16 %v1439_v19, %v1423_v38 }
 0x267   :  { %v1400_v27 = vsel %vm364_vm2, %v1352_v15, %v1356_v56  ;;  %v5362_v15 = vld [vmem:[#allocation28_spill] sm:$0xff] }
 0x268   :  { %v1440_v52 = vmul.f32 %v4201_v63, %v1400_v27  ;;  %3434 = vmatmul.mubr.msk.bf16.vlgmr.msra.gmra.mrb[20].mxu0 %vm1512_vm6, %v4985_v1  ;;  %v1271_v63 = vsel %vm299_vm3, %v5009_v36, %v1226_v3  ;;  %v1475_v40 = vpack.c.bf16 %v5362_v15, %v5361_v62  ;;  %v5371_v62 = vld [vmem:[#allocation24_spill] sm:$0xff]  ;;  %v5372_v15 = vld [vmem:[#allocation25_spill] sm:$0xff] }
 0x269   :  { %1720 = vmatprep.mubr.bf16.mxu0 %v5355_v11  ;;  %v1297_v9 = vmul.f32 %v4481_v37, %v1271_v63 }
 0x26a   :  { %v1228_v18 = vpop.permute.xlu0 %1227  ;;  %v1230_v29 = vpop.permute.xlu1 %1229  ;;  %v1488_v44 = vpack.c.bf16 %v1440_v52, %v1424_v60 }
 0x26b   :  { %v1272_v13 = vsel %vm299_vm3, %v1224_v54, %v1228_v18  ;;  %v1269_v21 = vsel %vm299_vm3, %v1226_v3, %v1230_v29 }
 0x26c   :  { %1649 = vmatprep.subr.bf16.mxu1 %v1488_v44  ;;  %v1313_v31 = vmul.f32 %v4481_v37, %v1272_v13  ;;  %v1298_v23 = vmul.f32 %v4484_v53, %v1269_v21  ;;  %v5365_v13 = vld [vmem:[#allocation13_spill] sm:$0xff] }
 0x26d   :  { %1650 = vmatpush1.bf16.msra.mxu1 %v1487_v48 }
 0x26e   :  { %v1232_v12 = vpop.permute.xlu0 %1231  ;;  %v1234_v33 = vpop.permute.xlu1 %1233  ;;  %v1457_v51 = vpack.c.bf16 %v1313_v31, %v1297_v9 }
 0x26f   :  { %v1270_v47 = vsel %vm299_vm3, %v1228_v18, %v1232_v12  ;;  %v1267_v37 = vsel %vm299_vm3, %v1230_v29, %v1234_v33 }
 0x270   :  { %v1314_v54 = vmul.f32 %v4484_v53, %v1270_v47  ;;  %3435 = vmatmul.mubr.msk.bf16.vlgmr.msra.gmra.mrb[20].mxu1 %vm1512_vm6, %v4985_v1  ;;  %v1299_v42 = vmul.f32 %v4284_v7, %v1267_v37  ;;  %v5367_v37 = vld [vmem:[#allocation15_spill] sm:$0xff] }
 0x271   :  { %1763 = vmatprep.mubr.bf16.mxu1 %v5355_v11 }
 0x272   :  { %v1236_v28 = vpop.permute.xlu0 %1235  ;;  %v5081_v36 = vpop.permute.xlu1 %1237  ;;  %v1458_v30 = vpack.c.bf16 %v1314_v54, %v1298_v23 }
 0x273   :  { %v1268_v0 = vsel %vm299_vm3, %v1232_v12, %v1236_v28  ;;  %v1265_v53 = vsel %vm299_vm3, %v1234_v33, %v5081_v36  ;;  %v5366_v12 = vld [vmem:[#allocation12_spill] sm:$0xff] }
 0x274   :  { %1688 = vmatprep.subr.bf16.mxu0 %v1458_v30  ;;  %v1315_v57 = vmul.f32 %v4284_v7, %v1268_v0  ;;  %v1300_v50 = vmul.f32 %v4265_v59, %v1265_v53 }
 0x275   :  { %1689 = vmatpush1.bf16.msra.mxu0 %v1457_v51 }
 0x276   :  { %v1240_v58 = vpop.permute.xlu0 %1239  ;;  %1690 = vmatprep.subr.bf16.mxu0 %v1474_v2  ;;  %v1358_v39 = vpop.permute.xlu1 %1357  ;;  %v1459_v24 = vpack.c.bf16 %v1315_v57, %v1299_v42  ;;  %v5368_v42 = vld [vmem:[#allocation21_spill] sm:$0xff] }
 0x277   :  { %v1266_v45 = vsel %vm299_vm3, %v1236_v28, %v1240_v58  ;;  %v1397_v7 = vsel %vm364_vm2, %v5047_v16, %v1358_v39 }
 0x278   :  { %v1316_v6 = vmul.f32 %v4265_v59, %v1266_v45  ;;  %v1425_v19 = vmul.f32 %v5363_v49, %v1397_v7 }
 0x279   :  { %1691 = vmatpush1.bf16.msra.mxu0 %v5358_v10 }
 0x27a   :  { %v1360_v34 = vpop.permute.xlu0 %1359  ;;  %v1362_v5 = vpop.permute.xlu1 %1361  ;;  %v1460_v4 = vpack.c.bf16 %v1316_v6, %v1300_v50 }
 0x27b   :  { %v1398_v35 = vsel %vm364_vm2, %v1356_v56, %v1360_v34  ;;  %v1395_v59 = vsel %vm364_vm2, %v1358_v39, %v1362_v5 }
 0x27c   :  { %1731 = vmatprep.subr.bf16.mxu1 %v1460_v4  ;;  %v1441_v22 = vmul.f32 %v5363_v49, %v1398_v35  ;;  %v1426_v56 = vmul.f32 %v5364_v14, %v1395_v59  ;;  %v5369_v4 = vld [vmem:[#allocation23_spill] sm:$0xff]  ;;  %v5370_v35 = vld [vmem:[#allocation17_spill] sm:$0xff]  ;;  %v5373_v49 = vld [vmem:[#allocation32_spill] sm:$0xff] }
 0x27d   :  { %1732 = vmatpush1.bf16.msra.mxu1 %v1459_v24 }
 0x27e   :  { %v1364_v8 = vpop.permute.xlu0 %1363  ;;  %1733 = vmatprep.subr.bf16.mxu1 %v1476_v17  ;;  %v1366_v61 = vpop.permute.xlu1 %1365  ;;  %v1489_v52 = vpack.c.bf16 %v1441_v22, %v1425_v19  ;;  %v5374_v22 = vld [vmem:[#allocation35_spill] sm:$0xff]  ;;  %v5376_v19 = vld [vmem:[#allocation34_spill] sm:$0xff] }
 0x27f   :  { %v1396_v55 = vsel %vm364_vm2, %v1360_v34, %v1364_v8  ;;  %v1393_v29 = vsel %vm364_vm2, %v1362_v5, %v1366_v61 }
 0x280   :  { %v1442_v3 = vmul.f32 %v5364_v14, %v1396_v55  ;;  %v1427_v47 = vmul.f32 %v5365_v13, %v1393_v29  ;;  %v1478_v55 = vpack.c.bf16 %v5374_v22, %v5373_v49  ;;  %v3788_v49 = vld [vmem:[#allocation6 + $0x38] sm:$0xff]   ;;  %v3790_v22 = vld [vmem:[#allocation6 + $0xb0] sm:$0xff]  }
 0x281   :  { %1734 = vmatpush1.bf16.msra.mxu1 %v1475_v40  ;;  %v1480_v40 = vpack.c.bf16 %v5372_v15, %v5371_v62  ;;  %v3786_v62 = vld [vmem:[#allocation6 + $0xa8] sm:$0xff]   ;;  %v3787_v15 = vld [vmem:[#allocation6 + $0x78] sm:$0xff]  }
 0x282   :  { %v1368_v27 = vpop.permute.xlu0 %1367  ;;  %v1370_v16 = vpop.permute.xlu1 %1369  ;;  %v1490_v60 = vpack.c.bf16 %v1442_v3, %v1426_v56  ;;  %v5375_v3 = vld [vmem:[#allocation33_spill] sm:$0xff] }
 0x283   :  { %v1394_v38 = vsel %vm364_vm2, %v1364_v8, %v1368_v27  ;;  %v1391_v18 = vsel %vm364_vm2, %v1366_v61, %v1370_v16 }
 0x284   :  { %1692 = vmatprep.subr.bf16.mxu0 %v1490_v60  ;;  %v1443_v21 = vmul.f32 %v5365_v13, %v1394_v38  ;;  %v1428_v33 = vmul.f32 %v5366_v12, %v1391_v18  ;;  %v5377_v38 = vld [vmem:[#allocation30_spill] sm:$0xff]  ;;  %v5378_v18 = vld [vmem:[#allocation31_spill] sm:$0xff]  ;;  %v5379_v13 = vld [vmem:[#allocation20_spill] sm:$0xff] }
 0x285   :  { %1693 = vmatpush1.bf16.msra.mxu0 %v1489_v52  ;;  %v1477_v29 = vpack.c.bf16 %v5378_v18, %v5377_v38  ;;  %v1900_v38 = vld [vmem:[#allocation3 + $0x40] sm:$0xff] }
 0x286   :  { %v1372_v44 = vpop.permute.xlu0 %1371  ;;  %v1242_v48 = vpop.permute.xlu1 %1241  ;;  %v1491_v28 = vpack.c.bf16 %v1443_v21, %v1427_v47 }
 0x287   :  { %v1392_v63 = vsel %vm364_vm2, %v1368_v27, %v1372_v44  ;;  %v1479_v27 = vpack.c.bf16 %v5376_v19, %v5375_v3  ;;  %v3797_v3 = vld [vmem:[#allocation6 + $0x1c0] sm:$0xff]  }
 0x288   :  { %v1444_v31 = vmul.f32 %v5366_v12, %v1392_v63  ;;  %3436 = vmatmul.mubr.msk.bf16.vlgmr.msra.gmra.mrb[24].mxu0 %vm1512_vm6, %v4985_v1  ;;  %v5380_v63 = vld [vmem:[#allocation22_spill] sm:$0xff] }
 0x289   :  { %1806 = vmatprep.mubr.bf16.mxu0 %v5355_v11 }
 0x28a   :  { %v1244_v23 = vpop.permute.xlu0 %1243  ;;  %v1246_v54 = vpop.permute.xlu1 %1245  ;;  %v1492_v9 = vpack.c.bf16 %v1444_v31, %v1428_v33 }
 0x28b   :  { %v1264_v53 = vsel %vm299_vm3, %v1240_v58, %v1244_v23  ;;  %v1261_v45 = vsel %vm299_vm3, %v1242_v48, %v1246_v54 }
 0x28c   :  { %1735 = vmatprep.subr.bf16.mxu1 %v1492_v9  ;;  %v1317_v10 = vmul.f32 %v5368_v42, %v1264_v53  ;;  %v1302_v24 = vmul.f32 %v5369_v4, %v1261_v45  ;;  %v5382_v53 = vld [vmem:[#allocation14_spill] sm:$0xff] }
 0x28d   :  { %1736 = vmatpush1.bf16.msra.mxu1 %v1491_v28  ;;  %v3761_v28 = vld [vmem:[#allocation6 + $0x40] sm:$0xff]  }
 0x28e   :  { %v1252_v30 = vpop.permute.xlu0 %1251  ;;  %v1250_v51 = vpop.permute.xlu1 %1249 }
 0x28f   :  { %v1258_v0 = vsel %vm299_vm3, %v1252_v30, %v4934_v20  ;;  %v1257_v2 = vsel %vm299_vm3, %v1250_v51, %v4927_v25  ;;  %v1259_v20 = vsel %vm299_vm3, %v1246_v54, %v1250_v51  ;;  %v1263_v25 = vsel %vm299_vm3, %v5081_v36, %v1242_v48 }
 0x290   :  { %v1320_v39 = vmul.f32 %v5367_v37, %v1258_v0  ;;  %v1304_v57 = vmul.f32 %v5367_v37, %v1257_v2  ;;  %3437 = vmatmul.mubr.msk.bf16.vlgmr.msra.gmra.mrb[24].mxu1 %vm1512_vm6, %v4985_v1  ;;  %v1303_v26 = vmul.f32 %v5370_v35, %v1259_v20  ;;  %v1301_v36 = vmul.f32 %v5368_v42, %v1263_v25  ;;  %v5381_v0 = vld [vmem:[#allocation16_spill] sm:$0xff]  ;;  %v3768_v42 = vld [vmem:[#allocation6 + $0x10] sm:$0xff]  }
 0x291   :  { %1849 = vmatprep.mubr.bf16.mxu1 %v5355_v11  ;;  %v3763_v25 = vld [vmem:[#allocation6 + $0x48] sm:$0xff]  }
 0x292   :  { %v1248_v58 = vpop.permute.xlu0 %1247  ;;  %v1374_v50 = vpop.permute.xlu1 %1373  ;;  %v1464_v6 = vpack.c.bf16 %v1320_v39, %v1304_v57  ;;  %v1461_v61 = vpack.c.bf16 %v1317_v10, %v1301_v36  ;;  %v3762_v57 = vld [vmem:[#allocation6] sm:$0xff]   ;;  %v3770_v10 = vld [vmem:[#allocation6 + $0x88] sm:$0xff]  }
 0x293   :  { %v1260_v34 = vsel %vm299_vm3, %v1248_v58, %v1252_v30  ;;  %v1262_v5 = vsel %vm299_vm3, %v1244_v23, %v1248_v58  ;;  %v1389_v14 = vsel %vm364_vm2, %v1370_v16, %v1374_v50  ;;  %v3765_v58 = vld [vmem:[#allocation6 + $0xc0] sm:$0xff]  }
 0x294   :  { %v1318_v11 = vmul.f32 %v5369_v4, %v1262_v5  ;;  %v1319_v43 = vmul.f32 %v5370_v35, %v1260_v34  ;;  %1817 = vmatprep.subr.bf16.mxu1 %v1464_v6  ;;  %v1429_v21 = vmul.f32 %v5379_v13, %v1389_v14  ;;  %v3769_v6 = vld [vmem:[#allocation6 + $0xc8] sm:$0xff]   ;;  %v3771_v34 = vld [vmem:[#allocation6 + $0x58] sm:$0xff]   ;;  %v3773_v5 = vld [vmem:[#allocation6 + $0xd0] sm:$0xff]  }
 0x295   :  { %v3772_v4 = vld [vmem:[#allocation6 + $0x18] sm:$0xff]   ;;  %v3775_v35 = vld [vmem:[#allocation6 + $0x60] sm:$0xff]  }
 0x296   :  { %v1463_v17 = vpack.c.bf16 %v1319_v43, %v1303_v26  ;;  %v1380_v59 = vpop.permute.xlu0 %1379  ;;  %v1378_v7 = vpop.permute.xlu1 %1377  ;;  %v1462_v8 = vpack.c.bf16 %v1318_v11, %v1302_v24  ;;  %v3774_v24 = vld [vmem:[#allocation6 + $0x90] sm:$0xff]   ;;  %v3777_v26 = vld [vmem:[#allocation6 + $0xd8] sm:$0xff]   ;;  %v3776_v11 = vld [vmem:[#allocation6 + $0x20] sm:$0xff]  }
 0x297   :  { %v1387_v56 = vsel %vm364_vm2, %v1374_v50, %v1378_v7  ;;  %v3767_v50 = vld [vmem:[#allocation6 + $0x50] sm:$0xff]   ;;  %v3779_v43 = vld [vmem:[#allocation6 + $0x68] sm:$0xff]   ;;  %v3781_v36 = vld [vmem:[#allocation6 + $0xe0] sm:$0xff]  }
 0x298   :  { %1774 = vmatprep.subr.bf16.mxu0 %v1462_v8  ;;  %1818 = vmatpush1.bf16.msra.mxu1 %v1463_v17  ;;  %v1430_v12 = vmul.f32 %v5380_v63, %v1387_v56  ;;  %v3780_v17 = vld [vmem:[#allocation6 + $0x28] sm:$0xff]   ;;  %v3792_v14 = vld [vmem:[#allocation6 + $0xf8] sm:$0xff]  }
 0x299   :  { %1775 = vmatpush1.bf16.msra.mxu0 %v1461_v61  ;;  %1819 = vmatprep.subr.bf16.mxu1 %v1480_v40  ;;  %v3785_v8 = vld [vmem:[#allocation6 + $0xe8] sm:$0xff]   ;;  %v3784_v61 = vld [vmem:[#allocation6 + $0x30] sm:$0xff]   ;;  %v3794_v56 = vld [vmem:[#allocation6 + $0xb8] sm:$0xff]  }
 0x29a   :  { %v1376_v60 = vpop.permute.xlu0 %1375  ;;  %1776 = vmatprep.subr.bf16.mxu0 %v1478_v55  ;;  %v1382_v52 = vpop.permute.xlu1 %1381  ;;  %v3789_v40 = vld [vmem:[#allocation6 + $0xf0] sm:$0xff]   ;;  %v3791_v55 = vld [vmem:[#allocation6 + $0x140] sm:$0xff]  }
 0x29b   :  { %v1388_v48 = vsel %vm364_vm2, %v1376_v60, %v1380_v59  ;;  %v1390_v16 = vsel %vm364_vm2, %v1372_v44, %v1376_v60  ;;  %v1385_v47 = vsel %vm364_vm2, %v1378_v7, %v1382_v52  ;;  %v1415_v23 = vsel %vm364_vm2, %v1382_v52, %v4936_v41  ;;  %v3783_v7 = vld [vmem:[#allocation6 + $0x70] sm:$0xff]  }
 0x29c   :  { %v1445_v33 = vmul.f32 %v5379_v13, %v1390_v16  ;;  %v1446_v31 = vmul.f32 %v5380_v63, %v1388_v48  ;;  %1820 = vmatpush1.bf16.msra.mxu1 %v1479_v27  ;;  %v1431_v2 = vmul.f32 %v5381_v0, %v1385_v47  ;;  %v1432_v37 = vmul.f32 %v5382_v53, %v1415_v23  ;;  %v1892_v27 = vld [vmem:[#allocation3] sm:$0xff] }
 0x29d   :  { %1777 = vmatpush1.bf16.msra.mxu0 %v1477_v29  ;;  %v1908_v29 = vunpack.c.l.bf16 %v1892_v27  ;;  %v1925_v23 = vunpack.c.h.bf16 %v1900_v38 }
 0x29e   :  { %v1493_v54 = vpack.c.bf16 %v1445_v33, %v1429_v21  ;;  %v1384_v9 = vpop.permute.xlu0 %1383  ;;  %v1494_v44 = vpack.c.bf16 %v1446_v31, %v1430_v12  ;;  %v1909_v21 = vunpack.c.h.bf16 %v1892_v27  ;;  %v1924_v33 = vunpack.c.l.bf16 %v1900_v38  ;;  %v3808_v27 = vld [vmem:[#allocation6 + $0x120] sm:$0xff]   ;;  %v3811_v38 = vld [vmem:[#allocation6 + $0x168] sm:$0xff]  }
 0x29f   :  { %v1386_v30 = vsel %vm364_vm2, %v1380_v59, %v1384_v9  ;;  %v1416_v51 = vsel %vm364_vm2, %v1384_v9, %v4951_v46  ;;  %v3766_v46 = vld [vmem:[#allocation6 + $0x80] sm:$0xff]  }
 0x2a0   :  { %v1447_v39 = vmul.f32 %v5381_v0, %v1386_v30  ;;  %v1448_v41 = vmul.f32 %v5382_v53, %v1416_v51  ;;  %1778 = vmatprep.subr.bf16.mxu0 %v1494_v44  ;;  %v3782_v59 = vld [vmem:[#allocation6 + $0xa0] sm:$0xff]   ;;  %v1901_v30 = vld [vmem:[#allocation3 + $0x48] sm:$0xff] }
 0x2a1   :  { %1779 = vmatpush1.bf16.msra.mxu0 %v1493_v54  ;;  %v1893_v54 = vld [vmem:[#allocation3 + $0x8] sm:$0xff] }
 0x2a2   :  { %v1495_v45 = vpack.c.bf16 %v1447_v39, %v1431_v2  ;;  %v1496_v20 = vpack.c.bf16 %v1448_v41, %v1432_v37  ;;  %3568 = vmatprep.subr.bf16.mxu0 %v3761_v28  ;;  %v1910_v41 = vunpack.c.l.bf16 %v1893_v54 }
 0x2a4   :  { %3438 = vmatmul.mubr.msk.bf16.vlgmr.msra.gmra.mrb[28].mxu0 %vm1512_vm6, %v4985_v1  ;;  %1821 = vmatprep.subr.bf16.mxu1 %v1496_v20 }
 0x2a5   :  { %1822 = vmatpush1.bf16.msra.mxu1 %v1495_v45  ;;  %3569 = vmatpush3.bf16.msra.mxu0 %v3762_v57  ;;  %v1911_v45 = vunpack.c.h.bf16 %v1893_v54 }
 0x2a6   :  { %3570 = vmatprep.subr.bf16.mxu0 %v3763_v25  ;;  %3590 = vmatprep.subr.bf16.mxu1 %v3765_v58 }
 0x2a8   :  { %3439 = vmatmul.mubr.msk.bf16.vlgmr.msra.gmra.mrb[28].mxu1 %vm1512_vm6, %v4985_v1  ;;  %v3778_v1 = vld [vmem:[#allocation6 + $0x98] sm:$0xff]  }
 0x2a9   :  { %3571 = vmatpush3.bf16.msra.mxu0 %v3764_v32  ;;  %3591 = vmatpush3.bf16.msra.mxu1 %v3766_v46  ;;  %v1926_v46 = vunpack.c.l.bf16 %v1901_v30 }
 0x2aa   :  { %3572 = vmatprep.subr.bf16.mxu0 %v3767_v50  ;;  %3592 = vmatprep.subr.bf16.mxu1 %v3769_v6 }
 0x2ab   :  { %v5201_v19 = vpop.permute.xlu1 %1500 }
 0x2ad   :  { %3573 = vmatpush3.bf16.msra.mxu0 %v3768_v42  ;;  %3593 = vmatpush3.bf16.msra.mxu1 %v3770_v10  ;;  %v1927_v10 = vunpack.c.h.bf16 %v1901_v30  ;;  %v3817_v30 = vld [vmem:[#allocation6 + $0x1e8] sm:$0xff]  }
 0x2ae   :  { %3574 = vmatprep.subr.bf16.mxu0 %v3771_v34  ;;  %3594 = vmatprep.subr.bf16.mxu1 %v3773_v5 }
 0x2af   :  { %v5203_v52 = vpop.permute.xlu0 %1504 }
 0x2b1   :  { %3575 = vmatpush3.bf16.msra.mxu0 %v3772_v4  ;;  %3595 = vmatpush3.bf16.msra.mxu1 %v3774_v24  ;;  %v3793_v24 = vld [vmem:[#allocation6 + $0x100] sm:$0xff]  }
 0x2b2   :  { %3576 = vmatprep.subr.bf16.mxu0 %v3775_v35  ;;  %3596 = vmatprep.subr.bf16.mxu1 %v3777_v26  ;;  %v3795_v26 = vld [vmem:[#allocation6 + $0x148] sm:$0xff]  }
 0x2b5   :  { %3577 = vmatpush3.bf16.msra.mxu0 %v3776_v11  ;;  %3597 = vmatpush3.bf16.msra.mxu1 %v3778_v1 }
 0x2b6   :  { %3578 = vmatprep.subr.bf16.mxu0 %v3779_v43  ;;  %3598 = vmatprep.subr.bf16.mxu1 %v3781_v36 }
 0x2b9   :  { %3579 = vmatpush3.bf16.msra.mxu0 %v3780_v17  ;;  %3599 = vmatpush3.bf16.msra.mxu1 %v3782_v59  ;;  %v3796_v59 = vld [vmem:[#allocation6 + $0x108] sm:$0xff]  }
 0x2ba   :  { %3580 = vmatprep.subr.bf16.mxu0 %v3783_v7  ;;  %3600 = vmatprep.subr.bf16.mxu1 %v3785_v8  ;;  %v3798_v8 = vld [vmem:[#allocation6 + $0x180] sm:$0xff]  }
 0x2bd   :  { %3581 = vmatpush3.bf16.msra.mxu0 %v3784_v61  ;;  %3601 = vmatpush3.bf16.msra.mxu1 %v3786_v62  ;;  %v3799_v61 = vld [vmem:[#allocation6 + $0x150] sm:$0xff]   ;;  %v3801_v62 = vld [vmem:[#allocation6 + $0x1c8] sm:$0xff]  }
 0x2be   :  { %3582 = vmatprep.subr.bf16.mxu0 %v3787_v15  ;;  %3602 = vmatprep.subr.bf16.mxu1 %v3789_v40  ;;  %v3800_v15 = vld [vmem:[#allocation6 + $0x110] sm:$0xff]   ;;  %v3802_v40 = vld [vmem:[#allocation6 + $0x188] sm:$0xff]  }
 0x2c1   :  { %3583 = vmatpush3.bf16.msra.mxu0 %v3788_v49  ;;  %3603 = vmatpush3.bf16.msra.mxu1 %v3790_v22  ;;  %v3803_v49 = vld [vmem:[#allocation6 + $0x158] sm:$0xff]   ;;  %v3805_v22 = vld [vmem:[#allocation6 + $0x1d0] sm:$0xff]  }
 0x2c2   :  { %3612 = vmatprep.subr.bf16.mxu0 %v3791_v55  ;;  %3604 = vmatprep.subr.bf16.mxu1 %v3792_v14  ;;  %v3804_v55 = vld [vmem:[#allocation6 + $0x118] sm:$0xff]   ;;  %v3806_v14 = vld [vmem:[#allocation6 + $0x190] sm:$0xff]  }
 0x2c5   :  { %3605 = vmatpush3.bf16.msra.mxu1 %v3794_v56  ;;  %v3807_v56 = vld [vmem:[#allocation6 + $0x160] sm:$0xff]  }
 0x2c6   :  { %3634 = vmatprep.subr.bf16.mxu1 %v3797_v3  ;;  %v3809_v3 = vld [vmem:[#allocation6 + $0x1d8] sm:$0xff]  }
 0x31e   :  { %v1550_v60 = vpop.f32.mrb[16].mxu0 }
 0x31f   :  { %v1552_v18 = vpop.f32.mrb[17].mxu0  ;;  %v1551_v48 = vadd.f32 %v1550_v60, %v5201_v19  ;;  %v3810_v60 = vld [vmem:[#allocation6 + $0x198] sm:$0xff]  }
 0x320   :  { %v1554_v16 = vpop.f32.mrb[18].mxu0  ;;  %v1553_v13 = vadd.f32 %v1552_v18, %v5201_v19  ;;  %v3813_v18 = vld [vmem:[#allocation6 + $0x1e0] sm:$0xff]  }
 0x321   :  { %v1555_v63 = vadd.f32 %v1554_v16, %v5203_v52  ;;  %v1556_v12 = vpop.f32.mrb[19].mxu0  ;;  %v1860_v31 = vmax.f32 %v1551_v48, 0.0  ;;  %v1894_v48 = vld [vmem:[#allocation3 + $0x10] sm:$0xff] }
 0x322   :  { %v1557_v47 = vadd.f32 %v1556_v12, %v5203_v52  ;;  %v1861_v9 = vmax.f32 %v1553_v13, 0.0  ;;  %v1902_v16 = vld [vmem:[#allocation3 + $0x50] sm:$0xff]  ;;  %v1912_v54 = vunpack.c.l.bf16 %v1894_v48 }
 0x323   :  { %v1876_v44 = vmax.f32 %v1555_v63, 0.0  ;;  %v1593_v28 = vpop.f32.mrb[16].mxu1  ;;  %v1940_v51 = vmul.f32 %v1908_v29, %v1860_v31  ;;  %v3812_v63 = vld [vmem:[#allocation6 + $0x128] sm:$0xff]   ;;  %v3814_v31 = vld [vmem:[#allocation6 + $0x1a0] sm:$0xff]  }
 0x324   :  { %v1877_v0 = vmax.f32 %v1557_v47, 0.0  ;;  %v1594_v2 = vadd.f32 %v1593_v28, %v5201_v19  ;;  %v1595_v53 = vpop.f32.mrb[17].mxu1  ;;  %v1941_v37 = vmul.f32 %v1909_v21, %v1861_v9  ;;  %v3815_v47 = vld [vmem:[#allocation6 + $0x170] sm:$0xff]  }
 0x325   :  { %v1956_v39 = vmul.f32 %v1924_v33, %v1876_v44  ;;  %v1596_v57 = vadd.f32 %v1595_v53, %v5201_v19  ;;  %v1597_v20 = vpop.f32.mrb[18].mxu1  ;;  %v1928_v44 = vunpack.c.l.bf16 %v1902_v16  ;;  %v1929_v53 = vunpack.c.h.bf16 %v1902_v16 }
 0x326   :  { %v1957_v25 = vmul.f32 %v1925_v23, %v1877_v0  ;;  %v1862_v58 = vmax.f32 %v1594_v2, 0.0  ;;  %v1598_v32 = vadd.f32 %v1597_v20, %v5203_v52  ;;  %v1599_v50 = vpop.f32.mrb[19].mxu1  ;;  %v1913_v0 = vunpack.c.h.bf16 %v1894_v48  ;;  %v3828_v48 = vld [vmem:[#allocation6 + $0x208] sm:$0xff]  }
 0x327   :  { %v1863_v6 = vmax.f32 %v1596_v57, 0.0  ;;  %v1600_v42 = vadd.f32 %v1599_v50, %v5203_v52  ;;  %v1972_v34 = vpack.c.bf16 %v1956_v39, %v1940_v51  ;;  %v3816_v39 = vld [vmem:[#allocation6 + $0x130] sm:$0xff]   ;;  %v3818_v57 = vld [vmem:[#allocation6 + $0x1a8] sm:$0xff]  }
 0x328   :  { %v1878_v5 = vmax.f32 %v1598_v32, 0.0  ;;  %v1973_v4 = vpack.c.bf16 %v1957_v25, %v1941_v37  ;;  %v1942_v11 = vmul.f32 %v1910_v41, %v1862_v58  ;;  %v3821_v58 = vld [vmem:[#allocation6 + $0x1f0] sm:$0xff]  }
 0x329   :  { %v1879_v35 = vmax.f32 %v1600_v42, 0.0  ;;  %v1943_v43 = vmul.f32 %v1911_v45, %v1863_v6  ;;  %v3819_v45 = vld [vmem:[#allocation6 + $0x178] sm:$0xff]  }
 0x32a   :  { %v1958_v1 = vmul.f32 %v1926_v46, %v1878_v5  ;;  %3044 = vmatprep.mubr.bf16.mxu0 %v1973_v4  ;;  %v1895_v6 = vld [vmem:[#allocation3 + $0x18] sm:$0xff] }
 0x32b   :  { %v1959_v36 = vmul.f32 %v1927_v10, %v1879_v35  ;;  %3045 = vmatmul.mubr.bf16.vlgmr.msra.gmra.mrb[32].mxu0 %v1972_v34  ;;  %v1903_v42 = vld [vmem:[#allocation3 + $0x58] sm:$0xff] }
 0x32c   :  { %v1974_v17 = vpack.c.bf16 %v1958_v1, %v1942_v11  ;;  %3613 = vmatpush3.bf16.msra.mxu0 %v3793_v24  ;;  %v3820_v4 = vld [vmem:[#allocation6 + $0x138] sm:$0xff]   ;;  %v3822_v11 = vld [vmem:[#allocation6 + $0x1b0] sm:$0xff]   ;;  %v3823_v1 = vld [vmem:[#allocation6 + $0x240] sm:$0xff]  }
 0x32d   :  { %3614 = vmatprep.subr.bf16.mxu0 %v3795_v26  ;;  %v1975_v7 = vpack.c.bf16 %v1959_v36, %v1943_v43  ;;  %v1914_v36 = vunpack.c.l.bf16 %v1895_v6 }
 0x32f   :  { %3085 = vmatprep.mubr.bf16.mxu1 %v1975_v7 }
 0x330   :  { %3615 = vmatpush3.bf16.msra.mxu0 %v3796_v59  ;;  %3086 = vmatmul.mubr.bf16.vlgmr.msra.gmra.mrb[32].mxu1 %v1974_v17  ;;  %v1930_v59 = vunpack.c.l.bf16 %v1903_v42 }
 0x331   :  { %3635 = vmatpush3.bf16.msra.mxu1 %v3798_v8  ;;  %3616 = vmatprep.subr.bf16.mxu0 %v3799_v61  ;;  %v3824_v8 = vld [vmem:[#allocation6 + $0x1f8] sm:$0xff]  }
 0x332   :  { %3636 = vmatprep.subr.bf16.mxu1 %v3801_v62  ;;  %v1915_v62 = vunpack.c.h.bf16 %v1895_v6 }
 0x334   :  { %3617 = vmatpush3.bf16.msra.mxu0 %v3800_v15 }
 0x335   :  { %3637 = vmatpush3.bf16.msra.mxu1 %v3802_v40  ;;  %3618 = vmatprep.subr.bf16.mxu0 %v3803_v49  ;;  %v1931_v40 = vunpack.c.h.bf16 %v1903_v42 }
 0x336   :  { %3638 = vmatprep.subr.bf16.mxu1 %v3805_v22  ;;  %v3825_v22 = vld [vmem:[#allocation6 + $0x200] sm:$0xff]  }
 0x338   :  { %3619 = vmatpush3.bf16.msra.mxu0 %v3804_v55 }
 0x339   :  { %3639 = vmatpush3.bf16.msra.mxu1 %v3806_v14  ;;  %3620 = vmatprep.subr.bf16.mxu0 %v3807_v56  ;;  %v3826_v14 = vld [vmem:[#allocation6 + $0x1b8] sm:$0xff]   ;;  %v3827_v56 = vld [vmem:[#allocation6 + $0x248] sm:$0xff]  }
 0x33a   :  { %3640 = vmatprep.subr.bf16.mxu1 %v3809_v3 }
 0x33b   :  { %v1636_v29 = vpop.f32.mrb[20].mxu0 }
 0x33c   :  { %v1637_v13 = vadd.f32 %v1636_v29, %v5201_v19  ;;  %3621 = vmatpush3.bf16.msra.mxu0 %v3808_v27  ;;  %v1638_v21 = vpop.f32.mrb[21].mxu0 }
 0x33d   :  { %v1639_v12 = vadd.f32 %v1638_v21, %v5201_v19  ;;  %3641 = vmatpush3.bf16.msra.mxu1 %v3810_v60  ;;  %v1640_v33 = vpop.f32.mrb[22].mxu0  ;;  %3622 = vmatprep.subr.bf16.mxu0 %v3811_v38  ;;  %v3829_v60 = vld [vmem:[#allocation6 + $0x2c0] sm:$0xff]   ;;  %v3831_v21 = vld [vmem:[#allocation6 + $0x250] sm:$0xff]  }
 0x33e   :  { %v1864_v23 = vmax.f32 %v1637_v13, 0.0  ;;  %v1641_v9 = vadd.f32 %v1640_v33, %v5203_v52  ;;  %v1642_v28 = vpop.f32.mrb[23].mxu0  ;;  %3642 = vmatprep.subr.bf16.mxu1 %v3813_v18  ;;  %v3830_v13 = vld [vmem:[#allocation6 + $0x280] sm:$0xff]   ;;  %v3834_v33 = vld [vmem:[#allocation6 + $0x288] sm:$0xff]  }
 0x33f   :  { %v1865_v51 = vmax.f32 %v1639_v12, 0.0  ;;  %v1643_v2 = vadd.f32 %v1642_v28, %v5203_v52  ;;  %v3832_v12 = vld [vmem:[#allocation6 + $0x210] sm:$0xff]   ;;  %v3840_v28 = vld [vmem:[#allocation6 + $0x220] sm:$0xff]  }
 0x340   :  { %v1880_v37 = vmax.f32 %v1641_v9, 0.0  ;;  %3623 = vmatpush3.bf16.msra.mxu0 %v3812_v63  ;;  %v1944_v20 = vmul.f32 %v1912_v54, %v1864_v23  ;;  %v3833_v63 = vld [vmem:[#allocation6 + $0x2c8] sm:$0xff]   ;;  %v3836_v23 = vld [vmem:[#allocation6 + $0x218] sm:$0xff]   ;;  %v3838_v54 = vld [vmem:[#allocation6 + $0x290] sm:$0xff]  }
 0x341   :  { %v1881_v41 = vmax.f32 %v1643_v2, 0.0  ;;  %3643 = vmatpush3.bf16.msra.mxu1 %v3814_v31  ;;  %3624 = vmatprep.subr.bf16.mxu0 %v3815_v47  ;;  %v1945_v32 = vmul.f32 %v1913_v0, %v1865_v51  ;;  %v3835_v31 = vld [vmem:[#allocation6 + $0x258] sm:$0xff]   ;;  %v3837_v47 = vld [vmem:[#allocation6 + $0x2d0] sm:$0xff]   ;;  %v3839_v9 = vld [vmem:[#allocation6 + $0x260] sm:$0xff]  }
 0x342   :  { %v1960_v25 = vmul.f32 %v1928_v44, %v1880_v37  ;;  %3644 = vmatprep.subr.bf16.mxu1 %v3817_v30  ;;  %v3841_v44 = vld [vmem:[#allocation6 + $0x2d8] sm:$0xff]   ;;  %v3843_v51 = vld [vmem:[#allocation6 + $0x268] sm:$0xff]   ;;  %v3845_v0 = vld [vmem:[#allocation6 + $0x2e0] sm:$0xff]  }
 0x343   :  { %v1961_v46 = vmul.f32 %v1929_v53, %v1881_v41  ;;  %v1679_v50 = vpop.f32.mrb[20].mxu1  ;;  %v3842_v30 = vld [vmem:[#allocation6 + $0x298] sm:$0xff]   ;;  %v1896_v53 = vld [vmem:[#allocation3 + $0x20] sm:$0xff] }
 0x344   :  { %v1976_v10 = vpack.c.bf16 %v1960_v25, %v1944_v20  ;;  %v1680_v34 = vadd.f32 %v1679_v50, %v5201_v19  ;;  %3625 = vmatpush3.bf16.msra.mxu0 %v3816_v39  ;;  %v1681_v5 = vpop.f32.mrb[21].mxu1  ;;  %v1904_v37 = vld [vmem:[#allocation3 + $0x60] sm:$0xff] }
 0x345   :  { %v1682_v24 = vadd.f32 %v1681_v5, %v5201_v19  ;;  %3645 = vmatpush3.bf16.msra.mxu1 %v3818_v57  ;;  %v1683_v35 = vpop.f32.mrb[22].mxu1  ;;  %3626 = vmatprep.subr.bf16.mxu0 %v3819_v45  ;;  %v1977_v26 = vpack.c.bf16 %v1961_v46, %v1945_v32  ;;  %v3844_v57 = vld [vmem:[#allocation6 + $0x228] sm:$0xff]   ;;  %v3846_v25 = vld [vmem:[#allocation6 + $0x2a0] sm:$0xff]   ;;  %v1916_v46 = vunpack.c.l.bf16 %v1896_v53  ;;  %v1932_v6 = vunpack.c.l.bf16 %v1904_v37 }
 0x346   :  { %v1866_v43 = vmax.f32 %v1680_v34, 0.0  ;;  %v1684_v17 = vadd.f32 %v1683_v35, %v5203_v52  ;;  %v1685_v7 = vpop.f32.mrb[23].mxu1  ;;  %3646 = vmatprep.subr.bf16.mxu1 %v3821_v58  ;;  %v3847_v58 = vld [vmem:[#allocation6 + $0x270] sm:$0xff]   ;;  %v1917_v5 = vunpack.c.h.bf16 %v1896_v53  ;;  %v3860_v53 = vld [vmem:[#allocation6 + $0x308] sm:$0xff]  }
 0x347   :  { %v1867_v61 = vmax.f32 %v1682_v24, 0.0  ;;  %v1686_v15 = vadd.f32 %v1685_v7, %v5203_v52  ;;  %3126 = vmatprep.mubr.bf16.mxu0 %v1977_v26  ;;  %v1933_v24 = vunpack.c.h.bf16 %v1904_v37  ;;  %v3848_v26 = vld [vmem:[#allocation6 + $0x230] sm:$0xff]  }
 0x348   :  { %v1882_v49 = vmax.f32 %v1684_v17, 0.0  ;;  %3627 = vmatpush3.bf16.msra.mxu0 %v3820_v4  ;;  %v1946_v3 = vmul.f32 %v1914_v36, %v1866_v43  ;;  %v3851_v43 = vld [vmem:[#allocation6 + $0x278] sm:$0xff]  }
 0x349   :  { %v1883_v55 = vmax.f32 %v1686_v15, 0.0  ;;  %3647 = vmatpush3.bf16.msra.mxu1 %v3822_v11  ;;  %3656 = vmatprep.subr.bf16.mxu0 %v3823_v1  ;;  %v1947_v38 = vmul.f32 %v1915_v62, %v1867_v61  ;;  %v3850_v1 = vld [vmem:[#allocation6 + $0x2a8] sm:$0xff]  }
 0x34a   :  { %v1962_v27 = vmul.f32 %v1930_v59, %v1882_v49  ;;  %3648 = vmatprep.subr.bf16.mxu1 %v3824_v8  ;;  %v3853_v59 = vld [vmem:[#allocation6 + $0x2f0] sm:$0xff]   ;;  %v1897_v62 = vld [vmem:[#allocation3 + $0x28] sm:$0xff] }
 0x34b   :  { %v1963_v18 = vmul.f32 %v1931_v40, %v1883_v55  ;;  %3127 = vmatmul.mubr.bf16.vlgmr.msra.gmra.mrb[36].mxu0 %v1976_v10  ;;  %v3849_v10 = vld [vmem:[#allocation6 + $0x2e8] sm:$0xff]   ;;  %v3852_v55 = vld [vmem:[#allocation6 + $0x238] sm:$0xff]  }
 0x34c   :  { %v1978_v29 = vpack.c.bf16 %v1962_v27, %v1946_v3  ;;  %3657 = vmatpush3.bf16.msra.mxu0 %v3825_v22  ;;  %v1905_v15 = vld [vmem:[#allocation3 + $0x68] sm:$0xff]  ;;  %v3854_v27 = vld [vmem:[#allocation6 + $0x2b0] sm:$0xff]  }
 0x34d   :  { %3649 = vmatpush3.bf16.msra.mxu1 %v3826_v14  ;;  %3658 = vmatprep.subr.bf16.mxu0 %v3827_v56  ;;  %v1979_v16 = vpack.c.bf16 %v1963_v18, %v1947_v38  ;;  %v1918_v18 = vunpack.c.l.bf16 %v1897_v62 }
 0x34e   :  { %3678 = vmatprep.subr.bf16.mxu1 %v3829_v60  ;;  %v3855_v60 = vld [vmem:[#allocation6 + $0x340] sm:$0xff]  }
 0x34f   :  { %3167 = vmatprep.mubr.bf16.mxu1 %v1979_v16 }
 0x350   :  { %3659 = vmatpush3.bf16.msra.mxu0 %v3828_v48  ;;  %3168 = vmatmul.mubr.bf16.vlgmr.msra.gmra.mrb[36].mxu1 %v1978_v29  ;;  %v1934_v48 = vunpack.c.l.bf16 %v1905_v15 }
 0x351   :  { %3679 = vmatpush3.bf16.msra.mxu1 %v3830_v13  ;;  %3660 = vmatprep.subr.bf16.mxu0 %v3831_v21  ;;  %v3856_v13 = vld [vmem:[#allocation6 + $0x2f8] sm:$0xff]  }
 0x352   :  { %3680 = vmatprep.subr.bf16.mxu1 %v3833_v63  ;;  %v1919_v63 = vunpack.c.h.bf16 %v1897_v62  ;;  %v3877_v62 = vld [vmem:[#allocation6 + $0x3e0] sm:$0xff]  }
 0x354   :  { %3661 = vmatpush3.bf16.msra.mxu0 %v3832_v12 }
 0x355   :  { %3681 = vmatpush3.bf16.msra.mxu1 %v3834_v33  ;;  %3662 = vmatprep.subr.bf16.mxu0 %v3835_v31  ;;  %v1935_v33 = vunpack.c.h.bf16 %v1905_v15 }
 0x356   :  { %3682 = vmatprep.subr.bf16.mxu1 %v3837_v47  ;;  %v3857_v47 = vld [vmem:[#allocation6 + $0x300] sm:$0xff]  }
 0x358   :  { %3663 = vmatpush3.bf16.msra.mxu0 %v3836_v23 }
 0x359   :  { %3683 = vmatpush3.bf16.msra.mxu1 %v3838_v54  ;;  %3664 = vmatprep.subr.bf16.mxu0 %v3839_v9  ;;  %v3858_v54 = vld [vmem:[#allocation6 + $0x2b8] sm:$0xff]   ;;  %v3859_v9 = vld [vmem:[#allocation6 + $0x348] sm:$0xff]  }
 0x35a   :  { %3684 = vmatprep.subr.bf16.mxu1 %v3841_v44 }
 0x35b   :  { %v1722_v2 = vpop.f32.mrb[24].mxu0 }
 0x35c   :  { %v1723_v39 = vadd.f32 %v1722_v2, %v5201_v19  ;;  %3665 = vmatpush3.bf16.msra.mxu0 %v3840_v28  ;;  %v1724_v41 = vpop.f32.mrb[25].mxu0 }
 0x35d   :  { %v1725_v45 = vadd.f32 %v1724_v41, %v5201_v19  ;;  %3685 = vmatpush3.bf16.msra.mxu1 %v3842_v30  ;;  %v1726_v20 = vpop.f32.mrb[26].mxu0  ;;  %3666 = vmatprep.subr.bf16.mxu0 %v3843_v51  ;;  %v3861_v30 = vld [vmem:[#allocation6 + $0x3c0] sm:$0xff]   ;;  %v3863_v41 = vld [vmem:[#allocation6 + $0x350] sm:$0xff]  }
 0x35e   :  { %v1868_v32 = vmax.f32 %v1723_v39, 0.0  ;;  %v1727_v50 = vadd.f32 %v1726_v20, %v5203_v52  ;;  %v1728_v42 = vpop.f32.mrb[27].mxu0  ;;  %3686 = vmatprep.subr.bf16.mxu1 %v3845_v0  ;;  %v3862_v39 = vld [vmem:[#allocation6 + $0x380] sm:$0xff]   ;;  %v3866_v20 = vld [vmem:[#allocation6 + $0x388] sm:$0xff]  }
 0x35f   :  { %v1869_v34 = vmax.f32 %v1725_v45, 0.0  ;;  %v1729_v4 = vadd.f32 %v1728_v42, %v5203_v52  ;;  %v3864_v45 = vld [vmem:[#allocation6 + $0x310] sm:$0xff]  }
 0x360   :  { %v1884_v35 = vmax.f32 %v1727_v50, 0.0  ;;  %3667 = vmatpush3.bf16.msra.mxu0 %v3844_v57  ;;  %v1948_v36 = vmul.f32 %v1916_v46, %v1868_v32  ;;  %v3865_v57 = vld [vmem:[#allocation6 + $0x3c8] sm:$0xff]   ;;  %v3868_v32 = vld [vmem:[#allocation6 + $0x318] sm:$0xff]   ;;  %v3870_v46 = vld [vmem:[#allocation6 + $0x390] sm:$0xff]  }
 0x361   :  { %v1885_v11 = vmax.f32 %v1729_v4, 0.0  ;;  %3687 = vmatpush3.bf16.msra.mxu1 %v3846_v25  ;;  %3668 = vmatprep.subr.bf16.mxu0 %v3847_v58  ;;  %v1949_v7 = vmul.f32 %v1917_v5, %v1869_v34  ;;  %v3867_v25 = vld [vmem:[#allocation6 + $0x358] sm:$0xff]   ;;  %v3869_v58 = vld [vmem:[#allocation6 + $0x3d0] sm:$0xff]   ;;  %v3871_v50 = vld [vmem:[#allocation6 + $0x360] sm:$0xff]  }
 0x362   :  { %v1964_v17 = vmul.f32 %v1932_v6, %v1884_v35  ;;  %3688 = vmatprep.subr.bf16.mxu1 %v3849_v10  ;;  %v3873_v6 = vld [vmem:[#allocation6 + $0x3d8] sm:$0xff]   ;;  %v1898_v10 = vld [vmem:[#allocation3 + $0x30] sm:$0xff] }
 0x363   :  { %v1965_v8 = vmul.f32 %v1933_v24, %v1885_v11  ;;  %v1765_v61 = vpop.f32.mrb[24].mxu1  ;;  %v1906_v34 = vld [vmem:[#allocation3 + $0x70] sm:$0xff]  ;;  %v3872_v24 = vld [vmem:[#allocation6 + $0x320] sm:$0xff]   ;;  %v1899_v11 = vld [vmem:[#allocation3 + $0x38] sm:$0xff] }
 0x364   :  { %v1980_v40 = vpack.c.bf16 %v1964_v17, %v1948_v36  ;;  %v1766_v49 = vadd.f32 %v1765_v61, %v5201_v19  ;;  %3669 = vmatpush3.bf16.msra.mxu0 %v3848_v26  ;;  %v1767_v22 = vpop.f32.mrb[25].mxu1  ;;  %v1920_v17 = vunpack.c.l.bf16 %v1898_v10  ;;  %v1907_v61 = vld [vmem:[#allocation3 + $0x78] sm:$0xff] }
 0x365   :  { %v1768_v14 = vadd.f32 %v1767_v22, %v5201_v19  ;;  %3689 = vmatpush3.bf16.msra.mxu1 %v3850_v1  ;;  %v1769_v56 = vpop.f32.mrb[26].mxu1  ;;  %3670 = vmatprep.subr.bf16.mxu0 %v3851_v43  ;;  %v1981_v3 = vpack.c.bf16 %v1965_v8, %v1949_v7  ;;  %v3874_v1 = vld [vmem:[#allocation6 + $0x398] sm:$0xff]   ;;  %v3875_v43 = vld [vmem:[#allocation6 + $0x368] sm:$0xff]   ;;  %v1936_v7 = vunpack.c.l.bf16 %v1906_v34  ;;  %v1937_v22 = vunpack.c.h.bf16 %v1906_v34 }
 0x366   :  { %v1870_v38 = vmax.f32 %v1766_v49, 0.0  ;;  %v1770_v29 = vadd.f32 %v1769_v56, %v5203_v52  ;;  %v1771_v16 = vpop.f32.mrb[27].mxu1  ;;  %3690 = vmatprep.subr.bf16.mxu1 %v3853_v59 }
 0x367   :  { %v1871_v21 = vmax.f32 %v1768_v14, 0.0  ;;  %v1772_v12 = vadd.f32 %v1771_v16, %v5203_v52  ;;  %3208 = vmatprep.mubr.bf16.mxu0 %v1981_v3  ;;  %v1922_v3 = vunpack.c.l.bf16 %v1899_v11  ;;  %v1938_v16 = vunpack.c.l.bf16 %v1907_v61 }
 0x368   :  { %v1886_v31 = vmax.f32 %v1770_v29, 0.0  ;;  %3671 = vmatpush3.bf16.msra.mxu0 %v3852_v55  ;;  %v1950_v44 = vmul.f32 %v1918_v18, %v1870_v38  ;;  %v3876_v38 = vld [vmem:[#allocation6 + $0x328] sm:$0xff]  }
 0x369   :  { %v1887_v23 = vmax.f32 %v1772_v12, 0.0  ;;  %3691 = vmatpush3.bf16.msra.mxu1 %v3854_v27  ;;  %3700 = vmatprep.subr.bf16.mxu0 %v3855_v60  ;;  %v1951_v51 = vmul.f32 %v1919_v63, %v1871_v21  ;;  %v1923_v60 = vunpack.c.h.bf16 %v1899_v11  ;;  %v3878_v21 = vld [vmem:[#allocation6 + $0x3a0] sm:$0xff]   ;;  %v3879_v63 = vld [vmem:[#allocation6 + $0x370] sm:$0xff]  }
 0x36a   :  { %v1966_v28 = vmul.f32 %v1934_v48, %v1886_v31  ;;  %3692 = vmatprep.subr.bf16.mxu1 %v3856_v13  ;;  %v1939_v13 = vunpack.c.h.bf16 %v1907_v61 }
 0x36b   :  { %v1967_v0 = vmul.f32 %v1935_v33, %v1887_v23  ;;  %3209 = vmatmul.mubr.bf16.vlgmr.msra.gmra.mrb[40].mxu0 %v1980_v40  ;;  %v1921_v40 = vunpack.c.h.bf16 %v1898_v10 }
 0x36c   :  { %v1982_v2 = vpack.c.bf16 %v1966_v28, %v1950_v44  ;;  %3701 = vmatpush3.bf16.msra.mxu0 %v3857_v47 }
 0x36d   :  { %3693 = vmatpush3.bf16.msra.mxu1 %v3858_v54  ;;  %3702 = vmatprep.subr.bf16.mxu0 %v3859_v9  ;;  %v1983_v37 = vpack.c.bf16 %v1967_v0, %v1951_v51  ;;  %v3881_v54 = vld [vmem:[#allocation6 + $0x3e8] sm:$0xff]   ;;  %v3880_v0 = vld [vmem:[#allocation6 + $0x330] sm:$0xff]  }
 0x36e   :  { %3722 = vmatprep.subr.bf16.mxu1 %v3861_v30 }
 0x36f   :  { %3249 = vmatprep.mubr.bf16.mxu1 %v1983_v37  ;;  %v3882_v37 = vld [vmem:[#allocation6 + $0x3a8] sm:$0xff]  }
 0x370   :  { %3703 = vmatpush3.bf16.msra.mxu0 %v3860_v53  ;;  %3250 = vmatmul.mubr.bf16.vlgmr.msra.gmra.mrb[40].mxu1 %v1982_v2 }
 0x371   :  { %3723 = vmatpush3.bf16.msra.mxu1 %v3862_v39  ;;  %3704 = vmatprep.subr.bf16.mxu0 %v3863_v41  ;;  %v3883_v39 = vld [vmem:[#allocation6 + $0x378] sm:$0xff]  }
 0x372   :  { %3724 = vmatprep.subr.bf16.mxu1 %v3865_v57 }
 0x374   :  { %3705 = vmatpush3.bf16.msra.mxu0 %v3864_v45  ;;  %v3885_v45 = vld [vmem:[#allocation6 + $0x3f0] sm:$0xff]  }
 0x375   :  { %3725 = vmatpush3.bf16.msra.mxu1 %v3866_v20  ;;  %3706 = vmatprep.subr.bf16.mxu0 %v3867_v25 }
 0x376   :  { %3726 = vmatprep.subr.bf16.mxu1 %v3869_v58 }
 0x377   :  { %v1808_v42 = vpop.f32.mrb[28].mxu0 }
 0x378   :  { %v1809_v5 = vadd.f32 %v1808_v42, %v5201_v19  ;;  %3707 = vmatpush3.bf16.msra.mxu0 %v3868_v32  ;;  %v1810_v4 = vpop.f32.mrb[29].mxu0 }
 0x379   :  { %v1811_v35 = vadd.f32 %v1810_v4, %v5201_v19  ;;  %3727 = vmatpush3.bf16.msra.mxu1 %v3870_v46  ;;  %v1812_v26 = vpop.f32.mrb[30].mxu0  ;;  %3708 = vmatprep.subr.bf16.mxu0 %v3871_v50  ;;  %v3886_v46 = vld [vmem:[#allocation6 + $0x3b0] sm:$0xff]   ;;  %v3887_v50 = vld [vmem:[#allocation6 + $0x3f8] sm:$0xff]  }
 0x37a   :  { %v1872_v36 = vmax.f32 %v1809_v5, 0.0  ;;  %v1813_v59 = vadd.f32 %v1812_v26, %v5203_v52  ;;  %v1814_v8 = vpop.f32.mrb[31].mxu0  ;;  %3728 = vmatprep.subr.bf16.mxu1 %v3873_v6  ;;  %v3888_v6 = vld [vmem:[#allocation6 + $0x3b8] sm:$0xff]  }
 0x37b   :  { %v1873_v15 = vmax.f32 %v1811_v35, 0.0  ;;  %v1815_v49 = vadd.f32 %v1814_v8, %v5203_v52  ;;  %v1851_v55 = vpop.f32.mrb[28].mxu1 }
 0x37c   :  { %v1888_v14 = vmax.f32 %v1813_v59, 0.0  ;;  %v1852_v56 = vadd.f32 %v1851_v55, %v5201_v19  ;;  %3709 = vmatpush3.bf16.msra.mxu0 %v3872_v24  ;;  %v1853_v27 = vpop.f32.mrb[29].mxu1  ;;  %v1952_v12 = vmul.f32 %v1920_v17, %v1872_v36 }
 0x37d   :  { %v1889_v18 = vmax.f32 %v1815_v49, 0.0  ;;  %v1854_v29 = vadd.f32 %v1853_v27, %v5201_v19  ;;  %3729 = vmatpush3.bf16.msra.mxu1 %v3874_v1  ;;  %v1855_v48 = vpop.f32.mrb[30].mxu1  ;;  %3710 = vmatprep.subr.bf16.mxu0 %v3875_v43  ;;  %v1953_v9 = vmul.f32 %v1921_v40, %v1873_v15 }
 0x37e   :  { %v1968_v33 = vmul.f32 %v1936_v7, %v1888_v14  ;;  %v1874_v31 = vmax.f32 %v1852_v56, 0.0  ;;  %v1856_v47 = vadd.f32 %v1855_v48, %v5203_v52  ;;  %v1857_v23 = vpop.f32.mrb[31].mxu1  ;;  %3730 = vmatprep.subr.bf16.mxu1 %v3877_v62 }
 0x37f   :  { %v1969_v44 = vmul.f32 %v1937_v22, %v1889_v18  ;;  %v1875_v28 = vmax.f32 %v1854_v29, 0.0  ;;  %v1858_v19 = vadd.f32 %v1857_v23, %v5203_v52  ;;  %v3884_v52 = vld [vmem:[#allocation6 + $0x338] sm:$0xff]  }
 0x380   :  { %v1984_v30 = vpack.c.bf16 %v1968_v33, %v1952_v12  ;;  %v1890_v51 = vmax.f32 %v1856_v47, 0.0  ;;  %3711 = vmatpush3.bf16.msra.mxu0 %v3876_v38  ;;  %v1954_v41 = vmul.f32 %v1922_v3, %v1874_v31 }
 0x381   :  { %v1891_v2 = vmax.f32 %v1858_v19, 0.0  ;;  %3731 = vmatpush3.bf16.msra.mxu1 %v3878_v21  ;;  %3712 = vmatprep.subr.bf16.mxu0 %v3879_v63  ;;  %v1985_v53 = vpack.c.bf16 %v1969_v44, %v1953_v9  ;;  %v1955_v20 = vmul.f32 %v1923_v60, %v1875_v28 }
 0x382   :  { %v1970_v57 = vmul.f32 %v1938_v16, %v1890_v51  ;;  %3732 = vmatprep.subr.bf16.mxu1 %v3881_v54 }
 0x383   :  { %v1971_v25 = vmul.f32 %v1939_v13, %v1891_v2  ;;  %3290 = vmatprep.mubr.bf16.mxu0 %v1985_v53 }
 0x384   :  { %v1986_v58 = vpack.c.bf16 %v1970_v57, %v1954_v41  ;;  %3713 = vmatpush3.bf16.msra.mxu0 %v3880_v0 }
 0x385   :  { %3733 = vmatpush3.bf16.msra.mxu1 %v3882_v37  ;;  %3714 = vmatprep.subr.bf16.mxu0 %v3883_v39  ;;  %v1987_v32 = vpack.c.bf16 %v1971_v25, %v1955_v20 }
 0x386   :  { %3734 = vmatprep.subr.bf16.mxu1 %v3885_v45 }
 0x387   :  { %3331 = vmatprep.mubr.bf16.mxu1 %v1987_v32 }
 0x388   :  { %3715 = vmatpush3.bf16.msra.mxu0 %v3884_v52 }
 0x389   :  { %3735 = vmatpush3.bf16.msra.mxu1 %v3886_v46 }
 0x38a   :  { %3736 = vmatprep.subr.bf16.mxu1 %v3887_v50 }
 0x38b   :  { %3291 = vmatmul.mubr.bf16.vlgmr.msra.gmra.mrb[44].mxu0 %v1984_v30 }
 0x38d   :  { %3737 = vmatpush3.bf16.msra.mxu1 %v3888_v6 }
 0x390   :  { %3332 = vmatmul.mubr.bf16.vlgmr.msra.gmra.mrb[44].mxu1 %v1986_v58 }
 0x3fe   :  { %v3584_v42 = vpop.f32.mrb[32].mxu0 }
 0x3ff   :  { %v3585_v10 = vpop.f32.mrb[33].mxu0 }
 0x400   :  { %v3586_v34 = vadd.f32 %v3585_v10, %v3584_v42  ;;  %v3587_v5 = vpop.f32.mrb[34].mxu0 }
 0x401   :  { %v3588_v4 = vpop.f32.mrb[35].mxu0 }
 0x402   :  { %v3589_v24 = vadd.f32 %v3588_v4, %v3587_v5  ;;  %v3348_v4 = vstv %s5257_s5 }
 0x403   :  { %v3606_v35 = vpop.f32.mrb[32].mxu1 }
 0x404   :  { %v3607_v26 = vpop.f32.mrb[33].mxu1 }
 0x405   :  { %v3608_v11 = vadd.f32 %v3607_v26, %v3606_v35  ;;  %v3609_v1 = vpop.f32.mrb[34].mxu1 }
 0x406   :  { %v3610_v43 = vpop.f32.mrb[35].mxu1 }
 0x407   :  { %v3088_v36 = vadd.f32 %v3608_v11, %v3586_v34  ;;  %v3611_v17 = vadd.f32 %v3610_v43, %v3609_v1 }
 0x409   :  { %v3091_v59 = vadd.f32 %v3611_v17, %v3589_v24 }
 0x41e   :  { %v3628_v7 = vpop.f32.mrb[36].mxu0 }
 0x41f   :  { %v3629_v8 = vpop.f32.mrb[37].mxu0 }
 0x420   :  { %v3630_v61 = vadd.f32 %v3629_v8, %v3628_v7  ;;  %v3631_v62 = vpop.f32.mrb[38].mxu0 }
 0x421   :  { %v3632_v15 = vpop.f32.mrb[39].mxu0 }
 0x422   :  { %v3129_v40 = vadd.f32 %v3630_v61, %v3088_v36  ;;  %v3633_v49 = vadd.f32 %v3632_v15, %v3631_v62 }
 0x423   :  { %v3650_v22 = vpop.f32.mrb[36].mxu1 }
 0x424   :  { %v3132_v55 = vadd.f32 %v3633_v49, %v3091_v59  ;;  %v3651_v14 = vpop.f32.mrb[37].mxu1 }
 0x425   :  { %v3652_v56 = vadd.f32 %v3651_v14, %v3650_v22  ;;  %v3653_v3 = vpop.f32.mrb[38].mxu1 }
 0x426   :  { %v3654_v27 = vpop.f32.mrb[39].mxu1 }
 0x427   :  { %v3170_v60 = vadd.f32 %v3652_v56, %v3129_v40  ;;  %v3655_v38 = vadd.f32 %v3654_v27, %v3653_v3 }
 0x429   :  { %v3173_v18 = vadd.f32 %v3655_v38, %v3132_v55 }
 0x43e   :  { %v3672_v29 = vpop.f32.mrb[40].mxu0 }
 0x43f   :  { %v3673_v48 = vpop.f32.mrb[41].mxu0 }
 0x440   :  { %v3674_v16 = vadd.f32 %v3673_v48, %v3672_v29  ;;  %v3675_v13 = vpop.f32.mrb[42].mxu0 }
 0x441   :  { %v3676_v21 = vpop.f32.mrb[43].mxu0 }
 0x442   :  { %v3211_v63 = vadd.f32 %v3674_v16, %v3170_v60  ;;  %v3677_v12 = vadd.f32 %v3676_v21, %v3675_v13 }
 0x443   :  { %v3694_v33 = vpop.f32.mrb[40].mxu1 }
 0x444   :  { %v3214_v31 = vadd.f32 %v3677_v12, %v3173_v18  ;;  %v3695_v47 = vpop.f32.mrb[41].mxu1 }
 0x445   :  { %v3696_v23 = vadd.f32 %v3695_v47, %v3694_v33  ;;  %v3697_v54 = vpop.f32.mrb[42].mxu1 }
 0x446   :  { %v3698_v9 = vpop.f32.mrb[43].mxu1 }
 0x447   :  { %v3252_v44 = vadd.f32 %v3696_v23, %v3211_v63  ;;  %v3699_v28 = vadd.f32 %v3698_v9, %v3697_v54 }
 0x449   :  { %v3255_v19 = vadd.f32 %v3699_v28, %v3214_v31 }
 0x45e   :  { %v3716_v30 = vpop.f32.mrb[44].mxu0 }
 0x45f   :  { %v3717_v51 = vpop.f32.mrb[45].mxu0 }
 0x460   :  { %v3718_v0 = vadd.f32 %v3717_v51, %v3716_v30  ;;  %v3719_v2 = vpop.f32.mrb[46].mxu0 }
 0x461   :  { %v3720_v53 = vpop.f32.mrb[47].mxu0 }
 0x462   :  { %v3293_v37 = vadd.f32 %v3718_v0, %v3252_v44  ;;  %v3721_v39 = vadd.f32 %v3720_v53, %v3719_v2 }
 0x463   :  { %v3738_v41 = vpop.f32.mrb[44].mxu1 }
 0x464   :  { %v3296_v57 = vadd.f32 %v3721_v39, %v3255_v19  ;;  %v3739_v45 = vpop.f32.mrb[45].mxu1 }
 0x465   :  { %v3740_v20 = vadd.f32 %v3739_v45, %v3738_v41  ;;  %v3741_v25 = vpop.f32.mrb[46].mxu1 }
 0x466   :  { %v3742_v58 = vpop.f32.mrb[47].mxu1 }
 0x467   :  { %v3334_v52 = vadd.f32 %v3740_v20, %v3293_v37  ;;  %v3743_v32 = vadd.f32 %v3742_v58, %v3741_v25 }
 0x469   :  { %v3337_v46 = vadd.f32 %v3743_v32, %v3296_v57 }
 0x46b   :  { %v3340_v50 = vadd.f32 %v3337_v46, %v3334_v52 }
 0x46d   :  { %v3341_v6 = vrot.slane %v3340_v50, 4 }
 0x46f   :  { %v3342_v42 = vadd.f32 %v3341_v6, %v3340_v50 }
 0x471   :  { %v3343_v10 = vrot.slane %v3342_v42, 2 }
 0x473   :  { %v3344_v34 = vadd.f32 %v3343_v10, %v3342_v42 }
 0x475   :  { %v3345_v5 = vrot.slane %v3344_v34, 1 }
 0x477   :  { %v3346_v24 = vadd.f32 %v3345_v5, %v3344_v34 }
 0x479   :  { %v3349_v35 = vadd.f32 %v3348_v4, %v3346_v24 }
 0x47b   :  { %3350 = vst [vmem:[#allocation8] sm:$0x1] %v3349_v35 }
 0x47c   :  { %3946 = shalt.err (!%p3943_p6)
}
 0x47d   :  { %s3947_s19 = scalar_lea.hbm %s5258_s6, 16 }
 0x47e   :  { %p3948_p7 = scmp.ne.s32.totalorder %s5258_s6, %s3947_s19  ;;  %p3951_p8 = scmp.lt.u32.totalorder %s3947_s19, %s5258_s6 }
 0x480   :  { %p3953_p9 = pnand %p3951_p8, %p3948_p7 }
 0x482   :  { %3956 = shalt.err (!%p3953_p9)
}
 0x483   :  { %3360 = dma.vmem_to_hbm [thread:$0]  %s3358_s14, 16, %s5258_s6, [#allocation5]  }
 0x484   :  { %3961 = dma.done.wait [#allocation5], 16  }
 0x485   :  { %3962 = vsyncadd [#allocation5], 4294967280 }
 0x486   :  { %3364 = vsyncpa [#allocation4], 1 }
 0x487   :  { %3365 = vsyncpa [#allocation7], 1 }
 0x488   :  { %3366 = vsyncpa [#allocation5], 1 }

</bundles_post_ra>
